<compile_context>
chip_gen: v6e
topology: v6e:2x2x1
jax: 0.10.0
libtpu: 0.0.40
codegen_flags: <defaults>
</compile_context>

<pallas_src>
import numpy as np

import jax
import jax.numpy as jnp
from jax.experimental import pallas as pl
from jax.experimental.pallas import tpu as pltpu


# --------------------------------------------------------------------------
# One-time parameter preprocessing (plain numpy/JAX, outside the kernel)
# --------------------------------------------------------------------------

def _toeplitz_conv_mat(w, w_in):
    """w: (OC, IC, KH, KW) -> B: (KH, w_in*IC, w_out*OC) so that the valid
    conv of an (H, w_in*IC) activation (row-major (w, ic) columns) is
    sum_kh  act[kh:kh+h_out, :] @ B[kh]   with (w, oc)-ordered output columns."""
    w = np.asarray(w, np.float32)
    oc, ic, kh, kw = w.shape
    w_out = w_in - kw + 1
    B = np.zeros((kh, w_in * ic, w_out * oc), np.float32)
    for i in range(kh):
        for j in range(kw):
            blk = w[:, :, i, j].T                      # (IC, OC)
            for ow in range(w_out):
                r = (ow + j) * ic
                c = ow * oc
                B[i, r:r + ic, c:c + oc] = blk
    return B


def _pool_w_mats(w_in, c):
    """0/1 selection matrices: width-direction 2x2-pool columns (even/odd)."""
    w_out = w_in // 2
    se = np.zeros((w_in * c, w_out * c), np.float32)
    so = np.zeros((w_in * c, w_out * c), np.float32)
    for ow in range(w_out):
        for ch in range(c):
            se[(2 * ow) * c + ch, ow * c + ch] = 1.0
            so[(2 * ow + 1) * c + ch, ow * c + ch] = 1.0
    return np.stack([se, so])


def _pool_h_mats(h_in):
    """0/1 selection matrices: height-direction 2x2-pool rows (even/odd)."""
    h_out = h_in // 2
    se = np.zeros((h_out, h_in), np.float32)
    so = np.zeros((h_out, h_in), np.float32)
    for oh in range(h_out):
        se[oh, 2 * oh] = 1.0
        so[oh, 2 * oh + 1] = 1.0
    return np.stack([se, so])


def prepare_params(params):
    """Convert PyTorch-layout params into kernel-ready constants (done once)."""
    bf16, f32 = jnp.bfloat16, jnp.float32
    conv1_w = np.asarray(params["conv1_w"], np.float32)   # (6, 3, 5, 5)
    conv2_w = np.asarray(params["conv2_w"], np.float32)   # (16, 6, 5, 5)
    fc1_w = np.asarray(params["fc1_w"], np.float32)       # (120, 400)
    fc2_w = np.asarray(params["fc2_w"], np.float32)       # (84, 120)
    fc3_w = np.asarray(params["fc3_w"], np.float32)       # (nc, 84)

    # fc1 weight permuted to the kernel's (h, w*c) layout and split per h-row,
    # so the flatten matches PyTorch's NCHW x.view(-1, 16*5*5) exactly.
    wfc1 = fc1_w.reshape(120, 16, 5, 5).transpose(2, 3, 1, 0).reshape(5, 80, 120)

    return {
        "B1":  jnp.asarray(_toeplitz_conv_mat(conv1_w, w_in=32), bf16),   # (5, 96, 168)
        "b1":  jnp.asarray(np.tile(np.asarray(params["conv1_b"], np.float32), 28)[None, :], f32),
        "S1w": jnp.asarray(_pool_w_mats(28, 6), bf16),                    # (2, 168, 84)
        "S1h": jnp.asarray(_pool_h_mats(28), bf16),                       # (2, 14, 28)
        "B2":  jnp.asarray(_toeplitz_conv_mat(conv2_w, w_in=14), bf16),   # (5, 84, 160)
        "b2":  jnp.asarray(np.tile(np.asarray(params["conv2_b"], np.float32), 10)[None, :], f32),
        "S2w": jnp.asarray(_pool_w_mats(10, 16), bf16),                   # (2, 160, 80)
        "S2h": jnp.asarray(_pool_h_mats(10), bf16),                       # (2, 5, 10)
        "Wfc1": jnp.asarray(wfc1, bf16),                                  # (5, 80, 120)
        "bfc1": jnp.asarray(np.asarray(params["fc1_b"], np.float32)[None, :], f32),
        "Wfc2": jnp.asarray(fc2_w.T, bf16),                               # (120, 84)
        "bfc2": jnp.asarray(np.asarray(params["fc2_b"], np.float32)[None, :], f32),
        "Wfc3": jnp.asarray(fc3_w.T, bf16),                               # (84, nc)
        "bfc3": jnp.asarray(np.asarray(params["fc3_b"], np.float32)[None, :], f32),
    }


# --------------------------------------------------------------------------
# Fused Pallas kernel: one image per grid step, everything in VMEM
# --------------------------------------------------------------------------

def _lenet_fused_kernel(x_ref, B1_ref, b1_ref, S1w_ref, S1h_ref,
                        B2_ref, b2_ref, S2w_ref, S2h_ref,
                        Wfc1_ref, bfc1_ref, Wfc2_ref, bfc2_ref,
                        Wfc3_ref, bfc3_ref, out_ref):
    bf16, f32 = jnp.bfloat16, jnp.float32

    def mxu(a, b):  # bf16 operands, f32 accumulation on the MXU
        return jnp.dot(a.astype(bf16), b.astype(bf16), preferred_element_type=f32)

    x = x_ref[0]                                            # (32, 96) f32

    # conv1 + bias + ReLU : (32, 96) -> (28, 168)   [cols = (w, oc)]
    a1 = mxu(x[0:28, :], B1_ref[0])
    for kh in range(1, 5):
        a1 = a1 + mxu(x[kh:kh + 28, :], B1_ref[kh])
    a1 = jnp.maximum(a1 + b1_ref[...], 0.0)

    # 2x2 max-pool : (28, 168) -> (14, 84)
    p1 = jnp.maximum(mxu(a1, S1w_ref[0]), mxu(a1, S1w_ref[1]))      # width
    p1 = jnp.maximum(mxu(S1h_ref[0], p1), mxu(S1h_ref[1], p1))      # height

    # conv2 + bias + ReLU : (14, 84) -> (10, 160)
    a2 = mxu(p1[0:10, :], B2_ref[0])
    for kh in range(1, 5):
        a2 = a2 + mxu(p1[kh:kh + 10, :], B2_ref[kh])
    a2 = jnp.maximum(a2 + b2_ref[...], 0.0)

    # 2x2 max-pool : (10, 160) -> (5, 80)
    p2 = jnp.maximum(mxu(a2, S2w_ref[0]), mxu(a2, S2w_ref[1]))
    p2 = jnp.maximum(mxu(S2h_ref[0], p2), mxu(S2h_ref[1], p2))

    # fc1 : (5, 80) -> (1, 120)  (sum over the 5 h-rows; flatten done via
    # the pre-permuted per-row weights, no in-kernel reshape)
    h1 = mxu(p2[0:1, :], Wfc1_ref[0])
    for hh in range(1, 5):
        h1 = h1 + mxu(p2[hh:hh + 1, :], Wfc1_ref[hh])
    h1 = jnp.maximum(h1 + bfc1_ref[...], 0.0)

    # fc2 -> fc3
    h2 = jnp.maximum(mxu(h1, Wfc2_ref[...]) + bfc2_ref[...], 0.0)   # (1, 84)
    logits = mxu(h2, Wfc3_ref[...]) + bfc3_ref[...]                 # (1, nc)

    out_ref[0] = logits.astype(out_ref.dtype)


def small_model_forward(prepped, x_nchw):
    """x_nchw: [N, 3, 32, 32] float32 (PyTorch NCHW). Returns logits [N, nc]."""
    n, c, h, w = x_nchw.shape
    assert (c, h, w) == (3, 32, 32), "fused LeNet kernel expects 3x32x32 inputs"
    nc = prepped["bfc3"].shape[-1]

    # NCHW -> NHWC -> (N, H, W*C): rows = image rows, lanes = (width, channel).
    x2 = jnp.transpose(x_nchw.astype(jnp.float32), (0, 2, 3, 1)).reshape(n, 32, 96)

    weight_names = ["B1", "b1", "S1w", "S1h", "B2", "b2", "S2w", "S2h",
                    "Wfc1", "bfc1", "Wfc2", "bfc2", "Wfc3", "bfc3"]
    weights = [prepped[k] for k in weight_names]

    def const_spec(a):  # full-array block, resident across all grid steps
        return pl.BlockSpec(a.shape, (lambda b, _r=a.ndim: (0,) * _r))

    out = pl.pallas_call(
        _lenet_fused_kernel,
        out_shape=jax.ShapeDtypeStruct((n, 1, nc), jnp.float32),
        grid=(n,),
        in_specs=[pl.BlockSpec((1, 32, 96), lambda b: (b, 0, 0))]
                 + [const_spec(a) for a in weights],
        out_specs=pl.BlockSpec((1, 1, nc), lambda b: (b, 0, 0)),
        compiler_params=pltpu.CompilerParams(
            dimension_semantics=("parallel",)),
    )(x2, *weights)
    return out[:, 0, :]


# --------------------------------------------------------------------------
# Parameters, reference model, and test driver
# --------------------------------------------------------------------------

def init_params(key, num_classes=10):
    ks = jax.random.split(key, 10)

    def u(k, shape, fan_in):
        bound = 1.0 / jnp.sqrt(jnp.float32(fan_in))
        return jax.random.uniform(k, shape, jnp.float32, -bound, bound)

    return {
        "conv1_w": u(ks[0], (6, 3, 5, 5), 3 * 25),
        "conv1_b": u(ks[1], (6,), 3 * 25),
        "conv2_w": u(ks[2], (16, 6, 5, 5), 6 * 25),
        "conv2_b": u(ks[3], (16,), 6 * 25),
        "fc1_w": u(ks[4], (120, 400), 400),   # PyTorch Linear: [out, in]
        "fc1_b": u(ks[5], (120,), 400),
        "fc2_w": u(ks[6], (84, 120), 120),
        "fc2_b": u(ks[7], (84,), 120),
        "fc3_w": u(ks[8], (num_classes, 84), 84),
        "fc3_b": u(ks[9], (num_classes,), 84),
    }


def reference_forward(params, x_nchw):
    """Plain-JAX reference mirroring the PyTorch module (f32, highest precision)."""
    hp = jax.lax.Precision.HIGHEST
    y = jax.lax.conv_general_dilated(
        x_nchw.astype(jnp.float32), params["conv1_w"], (1, 1), "VALID",
        dimension_numbers=("NCHW", "OIHW", "NCHW"), precision=hp)
    y = jax.nn.relu(y + params["conv1_b"][None, :, None, None])
    y = jax.lax.reduce_window(y, -jnp.inf, jax.lax.max, (1, 1, 2, 2), (1, 1, 2, 2), "VALID")
    y = jax.lax.conv_general_dilated(
        y, params["conv2_w"], (1, 1), "VALID",
        dimension_numbers=("NCHW", "OIHW", "NCHW"), precision=hp)
    y = jax.nn.relu(y + params["conv2_b"][None, :, None, None])
    y = jax.lax.reduce_window(y, -jnp.inf, jax.lax.max, (1, 1, 2, 2), (1, 1, 2, 2), "VALID")
    y = y.reshape(y.shape[0], -1)                       # NCHW flatten, like x.view(-1, 400)
    y = jax.nn.relu(jnp.dot(y, params["fc1_w"].T, precision=hp) + params["fc1_b"])
    y = jax.nn.relu(jnp.dot(y, params["fc2_w"].T, precision=hp) + params["fc2_b"])
    return jnp.dot(y, params["fc3_w"].T, precision=hp) + params["fc3_b"]


if __name__ == "__main__":
    key = jax.random.PRNGKey(0)
    pkey, xkey = jax.random.split(key)
    params = init_params(pkey, num_classes=10)
    # LeNet on 32x32 RGB (CIFAR-like), batch=2 — matches the 16*5*5 flatten.
    x = jax.random.normal(xkey, (2, 3, 32, 32), dtype=jnp.float32)

    prepped = prepare_params(params)
    fwd = jax.jit(small_model_forward)
    logits = fwd(prepped, x)
    logits = jax.block_until_ready(logits)

    assert logits.shape == (2, 10), logits.shape
    assert bool(jnp.all(jnp.isfinite(logits)))

    ref = reference_forward(params, x)
    max_err = float(jnp.max(jnp.abs(logits - ref)))
    assert max_err < 5e-2, f"max abs error vs reference too large: {max_err}"

    print("KERNEL_OK")
</pallas_src>

<mosaic_0001>
module attributes {stable_mosaic.version = 11 : i64} {
  func.func @_lenet_fused_kernel(%arg0: i32, %arg1: memref<1x32x96xf32, #tpu.memory_space<vmem>>, %arg2: memref<5x96x168xbf16, #tpu.memory_space<vmem>>, %arg3: memref<1x168xf32, #tpu.memory_space<vmem>>, %arg4: memref<2x168x84xbf16, #tpu.memory_space<vmem>>, %arg5: memref<2x14x28xbf16, #tpu.memory_space<vmem>>, %arg6: memref<5x84x160xbf16, #tpu.memory_space<vmem>>, %arg7: memref<1x160xf32, #tpu.memory_space<vmem>>, %arg8: memref<2x160x80xbf16, #tpu.memory_space<vmem>>, %arg9: memref<2x5x10xbf16, #tpu.memory_space<vmem>>, %arg10: memref<5x80x120xbf16, #tpu.memory_space<vmem>>, %arg11: memref<1x120xf32, #tpu.memory_space<vmem>>, %arg12: memref<120x84xbf16, #tpu.memory_space<vmem>>, %arg13: memref<1x84xf32, #tpu.memory_space<vmem>>, %arg14: memref<84x10xbf16, #tpu.memory_space<vmem>>, %arg15: memref<1x10xf32, #tpu.memory_space<vmem>>, %arg16: memref<1x1x10xf32, #tpu.memory_space<vmem>>) attributes {dimension_semantics = [#tpu.dimension_semantics<parallel>], iteration_bounds = array<i64: 2>, scalar_prefetch = 0 : i64, scratch_operands = 0 : i64, tpu.core_type = #tpu.core_type<tc>, window_params = [{transform_indices = @transform_0, window_bounds = array<i64: 1, 32, 96>}, {pipeline_mode = #tpu.pipeline_mode<synchronous>, transform_indices = @transform_1, window_bounds = array<i64: 5, 96, 168>}, {pipeline_mode = #tpu.pipeline_mode<synchronous>, transform_indices = @transform_2, window_bounds = array<i64: 1, 168>}, {pipeline_mode = #tpu.pipeline_mode<synchronous>, transform_indices = @transform_3, window_bounds = array<i64: 2, 168, 84>}, {pipeline_mode = #tpu.pipeline_mode<synchronous>, transform_indices = @transform_4, window_bounds = array<i64: 2, 14, 28>}, {pipeline_mode = #tpu.pipeline_mode<synchronous>, transform_indices = @transform_5, window_bounds = array<i64: 5, 84, 160>}, {pipeline_mode = #tpu.pipeline_mode<synchronous>, transform_indices = @transform_6, window_bounds = array<i64: 1, 160>}, {pipeline_mode = #tpu.pipeline_mode<synchronous>, transform_indices = @transform_7, window_bounds = array<i64: 2, 160, 80>}, {pipeline_mode = #tpu.pipeline_mode<synchronous>, transform_indices = @transform_8, window_bounds = array<i64: 2, 5, 10>}, {pipeline_mode = #tpu.pipeline_mode<synchronous>, transform_indices = @transform_9, window_bounds = array<i64: 5, 80, 120>}, {pipeline_mode = #tpu.pipeline_mode<synchronous>, transform_indices = @transform_10, window_bounds = array<i64: 1, 120>}, {pipeline_mode = #tpu.pipeline_mode<synchronous>, transform_indices = @transform_11, window_bounds = array<i64: 120, 84>}, {pipeline_mode = #tpu.pipeline_mode<synchronous>, transform_indices = @transform_12, window_bounds = array<i64: 1, 84>}, {pipeline_mode = #tpu.pipeline_mode<synchronous>, transform_indices = @transform_13, window_bounds = array<i64: 84, 10>}, {pipeline_mode = #tpu.pipeline_mode<synchronous>, transform_indices = @transform_14, window_bounds = array<i64: 1, 10>}, {transform_indices = @transform_15, window_bounds = array<i64: 1, 1, 10>}]} {
    %c0 = arith.constant 0 : index
    %c0_0 = arith.constant 0 : index
    %c0_1 = arith.constant 0 : index
    %0 = vector.load %arg1[%c0, %c0_0, %c0_1] : memref<1x32x96xf32, #tpu.memory_space<vmem>>, vector<1x32x96xf32>
    %1 = vector.shape_cast %0 : vector<1x32x96xf32> to vector<32x96xf32>
    %2 = vector.extract_strided_slice %1 {offsets = [0, 0], sizes = [28, 96], strides = [1, 1]} : vector<32x96xf32> to vector<28x96xf32>
    %c0_2 = arith.constant 0 : index
    %c0_3 = arith.constant 0 : index
    %c0_4 = arith.constant 0 : index
    %3 = vector.load %arg2[%c0_2, %c0_3, %c0_4] : memref<5x96x168xbf16, #tpu.memory_space<vmem>>, vector<1x96x168xbf16>
    %4 = vector.shape_cast %3 : vector<1x96x168xbf16> to vector<96x168xbf16>
    %5 = arith.truncf %2 : vector<28x96xf32> to vector<28x96xbf16>
    %cst = arith.constant dense<0.000000e+00> : vector<28x168xf32>
    %6 = tpu.matmul %5, %4, %cst {dimension_numbers = #tpu.dot_dimension_numbers<[1], [0], [0], [1], [0, 0, 1, 1], [], []>} : vector<28x96xbf16>, vector<96x168xbf16>, vector<28x168xf32> -> vector<28x168xf32>
    %7 = vector.extract_strided_slice %1 {offsets = [1, 0], sizes = [28, 96], strides = [1, 1]} : vector<32x96xf32> to vector<28x96xf32>
    %c1 = arith.constant 1 : index
    %c0_5 = arith.constant 0 : index
    %c0_6 = arith.constant 0 : index
    %8 = vector.load %arg2[%c1, %c0_5, %c0_6] : memref<5x96x168xbf16, #tpu.memory_space<vmem>>, vector<1x96x168xbf16>
    %9 = vector.shape_cast %8 : vector<1x96x168xbf16> to vector<96x168xbf16>
    %10 = arith.truncf %7 : vector<28x96xf32> to vector<28x96xbf16>
    %cst_7 = arith.constant dense<0.000000e+00> : vector<28x168xf32>
    %11 = tpu.matmul %10, %9, %cst_7 {dimension_numbers = #tpu.dot_dimension_numbers<[1], [0], [0], [1], [0, 0, 1, 1], [], []>} : vector<28x96xbf16>, vector<96x168xbf16>, vector<28x168xf32> -> vector<28x168xf32>
    %12 = arith.addf %6, %11 : vector<28x168xf32>
    %13 = vector.extract_strided_slice %1 {offsets = [2, 0], sizes = [28, 96], strides = [1, 1]} : vector<32x96xf32> to vector<28x96xf32>
    %c2 = arith.constant 2 : index
    %c0_8 = arith.constant 0 : index
    %c0_9 = arith.constant 0 : index
    %14 = vector.load %arg2[%c2, %c0_8, %c0_9] : memref<5x96x168xbf16, #tpu.memory_space<vmem>>, vector<1x96x168xbf16>
    %15 = vector.shape_cast %14 : vector<1x96x168xbf16> to vector<96x168xbf16>
    %16 = arith.truncf %13 : vector<28x96xf32> to vector<28x96xbf16>
    %cst_10 = arith.constant dense<0.000000e+00> : vector<28x168xf32>
    %17 = tpu.matmul %16, %15, %cst_10 {dimension_numbers = #tpu.dot_dimension_numbers<[1], [0], [0], [1], [0, 0, 1, 1], [], []>} : vector<28x96xbf16>, vector<96x168xbf16>, vector<28x168xf32> -> vector<28x168xf32>
    %18 = arith.addf %12, %17 : vector<28x168xf32>
    %19 = vector.extract_strided_slice %1 {offsets = [3, 0], sizes = [28, 96], strides = [1, 1]} : vector<32x96xf32> to vector<28x96xf32>
    %c3 = arith.constant 3 : index
    %c0_11 = arith.constant 0 : index
    %c0_12 = arith.constant 0 : index
    %20 = vector.load %arg2[%c3, %c0_11, %c0_12] : memref<5x96x168xbf16, #tpu.memory_space<vmem>>, vector<1x96x168xbf16>
    %21 = vector.shape_cast %20 : vector<1x96x168xbf16> to vector<96x168xbf16>
    %22 = arith.truncf %19 : vector<28x96xf32> to vector<28x96xbf16>
    %cst_13 = arith.constant dense<0.000000e+00> : vector<28x168xf32>
    %23 = tpu.matmul %22, %21, %cst_13 {dimension_numbers = #tpu.dot_dimension_numbers<[1], [0], [0], [1], [0, 0, 1, 1], [], []>} : vector<28x96xbf16>, vector<96x168xbf16>, vector<28x168xf32> -> vector<28x168xf32>
    %24 = arith.addf %18, %23 : vector<28x168xf32>
    %25 = vector.extract_strided_slice %1 {offsets = [4, 0], sizes = [28, 96], strides = [1, 1]} : vector<32x96xf32> to vector<28x96xf32>
    %c4 = arith.constant 4 : index
    %c0_14 = arith.constant 0 : index
    %c0_15 = arith.constant 0 : index
    %26 = vector.load %arg2[%c4, %c0_14, %c0_15] : memref<5x96x168xbf16, #tpu.memory_space<vmem>>, vector<1x96x168xbf16>
    %27 = vector.shape_cast %26 : vector<1x96x168xbf16> to vector<96x168xbf16>
    %28 = arith.truncf %25 : vector<28x96xf32> to vector<28x96xbf16>
    %cst_16 = arith.constant dense<0.000000e+00> : vector<28x168xf32>
    %29 = tpu.matmul %28, %27, %cst_16 {dimension_numbers = #tpu.dot_dimension_numbers<[1], [0], [0], [1], [0, 0, 1, 1], [], []>} : vector<28x96xbf16>, vector<96x168xbf16>, vector<28x168xf32> -> vector<28x168xf32>
    %30 = arith.addf %24, %29 : vector<28x168xf32>
    %c0_17 = arith.constant 0 : index
    %c0_18 = arith.constant 0 : index
    %31 = vector.load %arg3[%c0_17, %c0_18] : memref<1x168xf32, #tpu.memory_space<vmem>>, vector<1x168xf32>
    %32 = vector.broadcast %31 : vector<1x168xf32> to vector<28x168xf32>
    %33 = arith.addf %30, %32 : vector<28x168xf32>
    %cst_19 = arith.constant 0.000000e+00 : f32
    %34 = vector.broadcast %cst_19 : f32 to vector<28x168xf32>
    %35 = arith.maximumf %33, %34 : vector<28x168xf32>
    %c0_20 = arith.constant 0 : index
    %c0_21 = arith.constant 0 : index
    %c0_22 = arith.constant 0 : index
    %36 = vector.load %arg4[%c0_20, %c0_21, %c0_22] : memref<2x168x84xbf16, #tpu.memory_space<vmem>>, vector<1x168x84xbf16>
    %37 = vector.shape_cast %36 : vector<1x168x84xbf16> to vector<168x84xbf16>
    %38 = arith.truncf %35 : vector<28x168xf32> to vector<28x168xbf16>
    %cst_23 = arith.constant dense<0.000000e+00> : vector<28x84xf32>
    %39 = tpu.matmul %38, %37, %cst_23 {dimension_numbers = #tpu.dot_dimension_numbers<[1], [0], [0], [1], [0, 0, 1, 1], [], []>} : vector<28x168xbf16>, vector<168x84xbf16>, vector<28x84xf32> -> vector<28x84xf32>
    %c1_24 = arith.constant 1 : index
    %c0_25 = arith.constant 0 : index
    %c0_26 = arith.constant 0 : index
    %40 = vector.load %arg4[%c1_24, %c0_25, %c0_26] : memref<2x168x84xbf16, #tpu.memory_space<vmem>>, vector<1x168x84xbf16>
    %41 = vector.shape_cast %40 : vector<1x168x84xbf16> to vector<168x84xbf16>
    %42 = arith.truncf %35 : vector<28x168xf32> to vector<28x168xbf16>
    %cst_27 = arith.constant dense<0.000000e+00> : vector<28x84xf32>
    %43 = tpu.matmul %42, %41, %cst_27 {dimension_numbers = #tpu.dot_dimension_numbers<[1], [0], [0], [1], [0, 0, 1, 1], [], []>} : vector<28x168xbf16>, vector<168x84xbf16>, vector<28x84xf32> -> vector<28x84xf32>
    %44 = arith.maximumf %39, %43 : vector<28x84xf32>
    %c0_28 = arith.constant 0 : index
    %c0_29 = arith.constant 0 : index
    %c0_30 = arith.constant 0 : index
    %45 = vector.load %arg5[%c0_28, %c0_29, %c0_30] : memref<2x14x28xbf16, #tpu.memory_space<vmem>>, vector<1x14x28xbf16>
    %46 = vector.shape_cast %45 : vector<1x14x28xbf16> to vector<14x28xbf16>
    %47 = arith.truncf %44 : vector<28x84xf32> to vector<28x84xbf16>
    %cst_31 = arith.constant dense<0.000000e+00> : vector<14x84xf32>
    %48 = tpu.matmul %46, %47, %cst_31 {dimension_numbers = #tpu.dot_dimension_numbers<[1], [0], [0], [1], [0, 0, 1, 1], [], []>} : vector<14x28xbf16>, vector<28x84xbf16>, vector<14x84xf32> -> vector<14x84xf32>
    %c1_32 = arith.constant 1 : index
    %c0_33 = arith.constant 0 : index
    %c0_34 = arith.constant 0 : index
    %49 = vector.load %arg5[%c1_32, %c0_33, %c0_34] : memref<2x14x28xbf16, #tpu.memory_space<vmem>>, vector<1x14x28xbf16>
    %50 = vector.shape_cast %49 : vector<1x14x28xbf16> to vector<14x28xbf16>
    %51 = arith.truncf %44 : vector<28x84xf32> to vector<28x84xbf16>
    %cst_35 = arith.constant dense<0.000000e+00> : vector<14x84xf32>
    %52 = tpu.matmul %50, %51, %cst_35 {dimension_numbers = #tpu.dot_dimension_numbers<[1], [0], [0], [1], [0, 0, 1, 1], [], []>} : vector<14x28xbf16>, vector<28x84xbf16>, vector<14x84xf32> -> vector<14x84xf32>
    %53 = arith.maximumf %48, %52 : vector<14x84xf32>
    %54 = vector.extract_strided_slice %53 {offsets = [0, 0], sizes = [10, 84], strides = [1, 1]} : vector<14x84xf32> to vector<10x84xf32>
    %c0_36 = arith.constant 0 : index
    %c0_37 = arith.constant 0 : index
    %c0_38 = arith.constant 0 : index
    %55 = vector.load %arg6[%c0_36, %c0_37, %c0_38] : memref<5x84x160xbf16, #tpu.memory_space<vmem>>, vector<1x84x160xbf16>
    %56 = vector.shape_cast %55 : vector<1x84x160xbf16> to vector<84x160xbf16>
    %57 = arith.truncf %54 : vector<10x84xf32> to vector<10x84xbf16>
    %cst_39 = arith.constant dense<0.000000e+00> : vector<10x160xf32>
    %58 = tpu.matmul %57, %56, %cst_39 {dimension_numbers = #tpu.dot_dimension_numbers<[1], [0], [0], [1], [0, 0, 1, 1], [], []>} : vector<10x84xbf16>, vector<84x160xbf16>, vector<10x160xf32> -> vector<10x160xf32>
    %59 = vector.extract_strided_slice %53 {offsets = [1, 0], sizes = [10, 84], strides = [1, 1]} : vector<14x84xf32> to vector<10x84xf32>
    %c1_40 = arith.constant 1 : index
    %c0_41 = arith.constant 0 : index
    %c0_42 = arith.constant 0 : index
    %60 = vector.load %arg6[%c1_40, %c0_41, %c0_42] : memref<5x84x160xbf16, #tpu.memory_space<vmem>>, vector<1x84x160xbf16>
    %61 = vector.shape_cast %60 : vector<1x84x160xbf16> to vector<84x160xbf16>
    %62 = arith.truncf %59 : vector<10x84xf32> to vector<10x84xbf16>
    %cst_43 = arith.constant dense<0.000000e+00> : vector<10x160xf32>
    %63 = tpu.matmul %62, %61, %cst_43 {dimension_numbers = #tpu.dot_dimension_numbers<[1], [0], [0], [1], [0, 0, 1, 1], [], []>} : vector<10x84xbf16>, vector<84x160xbf16>, vector<10x160xf32> -> vector<10x160xf32>
    %64 = arith.addf %58, %63 : vector<10x160xf32>
    %65 = vector.extract_strided_slice %53 {offsets = [2, 0], sizes = [10, 84], strides = [1, 1]} : vector<14x84xf32> to vector<10x84xf32>
    %c2_44 = arith.constant 2 : index
    %c0_45 = arith.constant 0 : index
    %c0_46 = arith.constant 0 : index
    %66 = vector.load %arg6[%c2_44, %c0_45, %c0_46] : memref<5x84x160xbf16, #tpu.memory_space<vmem>>, vector<1x84x160xbf16>
    %67 = vector.shape_cast %66 : vector<1x84x160xbf16> to vector<84x160xbf16>
    %68 = arith.truncf %65 : vector<10x84xf32> to vector<10x84xbf16>
    %cst_47 = arith.constant dense<0.000000e+00> : vector<10x160xf32>
    %69 = tpu.matmul %68, %67, %cst_47 {dimension_numbers = #tpu.dot_dimension_numbers<[1], [0], [0], [1], [0, 0, 1, 1], [], []>} : vector<10x84xbf16>, vector<84x160xbf16>, vector<10x160xf32> -> vector<10x160xf32>
    %70 = arith.addf %64, %69 : vector<10x160xf32>
    %71 = vector.extract_strided_slice %53 {offsets = [3, 0], sizes = [10, 84], strides = [1, 1]} : vector<14x84xf32> to vector<10x84xf32>
    %c3_48 = arith.constant 3 : index
    %c0_49 = arith.constant 0 : index
    %c0_50 = arith.constant 0 : index
    %72 = vector.load %arg6[%c3_48, %c0_49, %c0_50] : memref<5x84x160xbf16, #tpu.memory_space<vmem>>, vector<1x84x160xbf16>
    %73 = vector.shape_cast %72 : vector<1x84x160xbf16> to vector<84x160xbf16>
    %74 = arith.truncf %71 : vector<10x84xf32> to vector<10x84xbf16>
    %cst_51 = arith.constant dense<0.000000e+00> : vector<10x160xf32>
    %75 = tpu.matmul %74, %73, %cst_51 {dimension_numbers = #tpu.dot_dimension_numbers<[1], [0], [0], [1], [0, 0, 1, 1], [], []>} : vector<10x84xbf16>, vector<84x160xbf16>, vector<10x160xf32> -> vector<10x160xf32>
    %76 = arith.addf %70, %75 : vector<10x160xf32>
    %77 = vector.extract_strided_slice %53 {offsets = [4, 0], sizes = [10, 84], strides = [1, 1]} : vector<14x84xf32> to vector<10x84xf32>
    %c4_52 = arith.constant 4 : index
    %c0_53 = arith.constant 0 : index
    %c0_54 = arith.constant 0 : index
    %78 = vector.load %arg6[%c4_52, %c0_53, %c0_54] : memref<5x84x160xbf16, #tpu.memory_space<vmem>>, vector<1x84x160xbf16>
    %79 = vector.shape_cast %78 : vector<1x84x160xbf16> to vector<84x160xbf16>
    %80 = arith.truncf %77 : vector<10x84xf32> to vector<10x84xbf16>
    %cst_55 = arith.constant dense<0.000000e+00> : vector<10x160xf32>
    %81 = tpu.matmul %80, %79, %cst_55 {dimension_numbers = #tpu.dot_dimension_numbers<[1], [0], [0], [1], [0, 0, 1, 1], [], []>} : vector<10x84xbf16>, vector<84x160xbf16>, vector<10x160xf32> -> vector<10x160xf32>
    %82 = arith.addf %76, %81 : vector<10x160xf32>
    %c0_56 = arith.constant 0 : index
    %c0_57 = arith.constant 0 : index
    %83 = vector.load %arg7[%c0_56, %c0_57] : memref<1x160xf32, #tpu.memory_space<vmem>>, vector<1x160xf32>
    %84 = vector.broadcast %83 : vector<1x160xf32> to vector<10x160xf32>
    %85 = arith.addf %82, %84 : vector<10x160xf32>
    %cst_58 = arith.constant 0.000000e+00 : f32
    %86 = vector.broadcast %cst_58 : f32 to vector<10x160xf32>
    %87 = arith.maximumf %85, %86 : vector<10x160xf32>
    %c0_59 = arith.constant 0 : index
    %c0_60 = arith.constant 0 : index
    %c0_61 = arith.constant 0 : index
    %88 = vector.load %arg8[%c0_59, %c0_60, %c0_61] : memref<2x160x80xbf16, #tpu.memory_space<vmem>>, vector<1x160x80xbf16>
    %89 = vector.shape_cast %88 : vector<1x160x80xbf16> to vector<160x80xbf16>
    %90 = arith.truncf %87 : vector<10x160xf32> to vector<10x160xbf16>
    %cst_62 = arith.constant dense<0.000000e+00> : vector<10x80xf32>
    %91 = tpu.matmul %90, %89, %cst_62 {dimension_numbers = #tpu.dot_dimension_numbers<[1], [0], [0], [1], [0, 0, 1, 1], [], []>} : vector<10x160xbf16>, vector<160x80xbf16>, vector<10x80xf32> -> vector<10x80xf32>
    %c1_63 = arith.constant 1 : index
    %c0_64 = arith.constant 0 : index
    %c0_65 = arith.constant 0 : index
    %92 = vector.load %arg8[%c1_63, %c0_64, %c0_65] : memref<2x160x80xbf16, #tpu.memory_space<vmem>>, vector<1x160x80xbf16>
    %93 = vector.shape_cast %92 : vector<1x160x80xbf16> to vector<160x80xbf16>
    %94 = arith.truncf %87 : vector<10x160xf32> to vector<10x160xbf16>
    %cst_66 = arith.constant dense<0.000000e+00> : vector<10x80xf32>
    %95 = tpu.matmul %94, %93, %cst_66 {dimension_numbers = #tpu.dot_dimension_numbers<[1], [0], [0], [1], [0, 0, 1, 1], [], []>} : vector<10x160xbf16>, vector<160x80xbf16>, vector<10x80xf32> -> vector<10x80xf32>
    %96 = arith.maximumf %91, %95 : vector<10x80xf32>
    %c0_67 = arith.constant 0 : index
    %c0_68 = arith.constant 0 : index
    %c0_69 = arith.constant 0 : index
    %97 = vector.load %arg9[%c0_67, %c0_68, %c0_69] : memref<2x5x10xbf16, #tpu.memory_space<vmem>>, vector<1x5x10xbf16>
    %98 = vector.shape_cast %97 : vector<1x5x10xbf16> to vector<5x10xbf16>
    %99 = arith.truncf %96 : vector<10x80xf32> to vector<10x80xbf16>
    %cst_70 = arith.constant dense<0.000000e+00> : vector<5x80xf32>
    %100 = tpu.matmul %98, %99, %cst_70 {dimension_numbers = #tpu.dot_dimension_numbers<[1], [0], [0], [1], [0, 0, 1, 1], [], []>} : vector<5x10xbf16>, vector<10x80xbf16>, vector<5x80xf32> -> vector<5x80xf32>
    %c1_71 = arith.constant 1 : index
    %c0_72 = arith.constant 0 : index
    %c0_73 = arith.constant 0 : index
    %101 = vector.load %arg9[%c1_71, %c0_72, %c0_73] : memref<2x5x10xbf16, #tpu.memory_space<vmem>>, vector<1x5x10xbf16>
    %102 = vector.shape_cast %101 : vector<1x5x10xbf16> to vector<5x10xbf16>
    %103 = arith.truncf %96 : vector<10x80xf32> to vector<10x80xbf16>
    %cst_74 = arith.constant dense<0.000000e+00> : vector<5x80xf32>
    %104 = tpu.matmul %102, %103, %cst_74 {dimension_numbers = #tpu.dot_dimension_numbers<[1], [0], [0], [1], [0, 0, 1, 1], [], []>} : vector<5x10xbf16>, vector<10x80xbf16>, vector<5x80xf32> -> vector<5x80xf32>
    %105 = arith.maximumf %100, %104 : vector<5x80xf32>
    %106 = vector.extract_strided_slice %105 {offsets = [0, 0], sizes = [1, 80], strides = [1, 1]} : vector<5x80xf32> to vector<1x80xf32>
    %c0_75 = arith.constant 0 : index
    %c0_76 = arith.constant 0 : index
    %c0_77 = arith.constant 0 : index
    %107 = vector.load %arg10[%c0_75, %c0_76, %c0_77] : memref<5x80x120xbf16, #tpu.memory_space<vmem>>, vector<1x80x120xbf16>
    %108 = vector.shape_cast %107 : vector<1x80x120xbf16> to vector<80x120xbf16>
    %109 = arith.truncf %106 : vector<1x80xf32> to vector<1x80xbf16>
    %cst_78 = arith.constant dense<0.000000e+00> : vector<1x120xf32>
    %110 = tpu.matmul %109, %108, %cst_78 {dimension_numbers = #tpu.dot_dimension_numbers<[1], [0], [0], [1], [0, 0, 1, 1], [], []>} : vector<1x80xbf16>, vector<80x120xbf16>, vector<1x120xf32> -> vector<1x120xf32>
    %111 = vector.extract_strided_slice %105 {offsets = [1, 0], sizes = [1, 80], strides = [1, 1]} : vector<5x80xf32> to vector<1x80xf32>
    %c1_79 = arith.constant 1 : index
    %c0_80 = arith.constant 0 : index
    %c0_81 = arith.constant 0 : index
    %112 = vector.load %arg10[%c1_79, %c0_80, %c0_81] : memref<5x80x120xbf16, #tpu.memory_space<vmem>>, vector<1x80x120xbf16>
    %113 = vector.shape_cast %112 : vector<1x80x120xbf16> to vector<80x120xbf16>
    %114 = arith.truncf %111 : vector<1x80xf32> to vector<1x80xbf16>
    %cst_82 = arith.constant dense<0.000000e+00> : vector<1x120xf32>
    %115 = tpu.matmul %114, %113, %cst_82 {dimension_numbers = #tpu.dot_dimension_numbers<[1], [0], [0], [1], [0, 0, 1, 1], [], []>} : vector<1x80xbf16>, vector<80x120xbf16>, vector<1x120xf32> -> vector<1x120xf32>
    %116 = arith.addf %110, %115 : vector<1x120xf32>
    %117 = vector.extract_strided_slice %105 {offsets = [2, 0], sizes = [1, 80], strides = [1, 1]} : vector<5x80xf32> to vector<1x80xf32>
    %c2_83 = arith.constant 2 : index
    %c0_84 = arith.constant 0 : index
    %c0_85 = arith.constant 0 : index
    %118 = vector.load %arg10[%c2_83, %c0_84, %c0_85] : memref<5x80x120xbf16, #tpu.memory_space<vmem>>, vector<1x80x120xbf16>
    %119 = vector.shape_cast %118 : vector<1x80x120xbf16> to vector<80x120xbf16>
    %120 = arith.truncf %117 : vector<1x80xf32> to vector<1x80xbf16>
    %cst_86 = arith.constant dense<0.000000e+00> : vector<1x120xf32>
    %121 = tpu.matmul %120, %119, %cst_86 {dimension_numbers = #tpu.dot_dimension_numbers<[1], [0], [0], [1], [0, 0, 1, 1], [], []>} : vector<1x80xbf16>, vector<80x120xbf16>, vector<1x120xf32> -> vector<1x120xf32>
    %122 = arith.addf %116, %121 : vector<1x120xf32>
    %123 = vector.extract_strided_slice %105 {offsets = [3, 0], sizes = [1, 80], strides = [1, 1]} : vector<5x80xf32> to vector<1x80xf32>
    %c3_87 = arith.constant 3 : index
    %c0_88 = arith.constant 0 : index
    %c0_89 = arith.constant 0 : index
    %124 = vector.load %arg10[%c3_87, %c0_88, %c0_89] : memref<5x80x120xbf16, #tpu.memory_space<vmem>>, vector<1x80x120xbf16>
    %125 = vector.shape_cast %124 : vector<1x80x120xbf16> to vector<80x120xbf16>
    %126 = arith.truncf %123 : vector<1x80xf32> to vector<1x80xbf16>
    %cst_90 = arith.constant dense<0.000000e+00> : vector<1x120xf32>
    %127 = tpu.matmul %126, %125, %cst_90 {dimension_numbers = #tpu.dot_dimension_numbers<[1], [0], [0], [1], [0, 0, 1, 1], [], []>} : vector<1x80xbf16>, vector<80x120xbf16>, vector<1x120xf32> -> vector<1x120xf32>
    %128 = arith.addf %122, %127 : vector<1x120xf32>
    %129 = vector.extract_strided_slice %105 {offsets = [4, 0], sizes = [1, 80], strides = [1, 1]} : vector<5x80xf32> to vector<1x80xf32>
    %c4_91 = arith.constant 4 : index
    %c0_92 = arith.constant 0 : index
    %c0_93 = arith.constant 0 : index
    %130 = vector.load %arg10[%c4_91, %c0_92, %c0_93] : memref<5x80x120xbf16, #tpu.memory_space<vmem>>, vector<1x80x120xbf16>
    %131 = vector.shape_cast %130 : vector<1x80x120xbf16> to vector<80x120xbf16>
    %132 = arith.truncf %129 : vector<1x80xf32> to vector<1x80xbf16>
    %cst_94 = arith.constant dense<0.000000e+00> : vector<1x120xf32>
    %133 = tpu.matmul %132, %131, %cst_94 {dimension_numbers = #tpu.dot_dimension_numbers<[1], [0], [0], [1], [0, 0, 1, 1], [], []>} : vector<1x80xbf16>, vector<80x120xbf16>, vector<1x120xf32> -> vector<1x120xf32>
    %134 = arith.addf %128, %133 : vector<1x120xf32>
    %c0_95 = arith.constant 0 : index
    %c0_96 = arith.constant 0 : index
    %135 = vector.load %arg11[%c0_95, %c0_96] : memref<1x120xf32, #tpu.memory_space<vmem>>, vector<1x120xf32>
    %136 = arith.addf %134, %135 : vector<1x120xf32>
    %cst_97 = arith.constant 0.000000e+00 : f32
    %137 = vector.broadcast %cst_97 : f32 to vector<1x120xf32>
    %138 = arith.maximumf %136, %137 : vector<1x120xf32>
    %c0_98 = arith.constant 0 : index
    %c0_99 = arith.constant 0 : index
    %139 = vector.load %arg12[%c0_98, %c0_99] : memref<120x84xbf16, #tpu.memory_space<vmem>>, vector<120x84xbf16>
    %140 = arith.truncf %138 : vector<1x120xf32> to vector<1x120xbf16>
    %cst_100 = arith.constant dense<0.000000e+00> : vector<1x84xf32>
    %141 = tpu.matmul %140, %139, %cst_100 {dimension_numbers = #tpu.dot_dimension_numbers<[1], [0], [0], [1], [0, 0, 1, 1], [], []>} : vector<1x120xbf16>, vector<120x84xbf16>, vector<1x84xf32> -> vector<1x84xf32>
    %c0_101 = arith.constant 0 : index
    %c0_102 = arith.constant 0 : index
    %142 = vector.load %arg13[%c0_101, %c0_102] : memref<1x84xf32, #tpu.memory_space<vmem>>, vector<1x84xf32>
    %143 = arith.addf %141, %142 : vector<1x84xf32>
    %cst_103 = arith.constant 0.000000e+00 : f32
    %144 = vector.broadcast %cst_103 : f32 to vector<1x84xf32>
    %145 = arith.maximumf %143, %144 : vector<1x84xf32>
    %c0_104 = arith.constant 0 : index
    %c0_105 = arith.constant 0 : index
    %146 = vector.load %arg14[%c0_104, %c0_105] : memref<84x10xbf16, #tpu.memory_space<vmem>>, vector<84x10xbf16>
    %147 = arith.truncf %145 : vector<1x84xf32> to vector<1x84xbf16>
    %cst_106 = arith.constant dense<0.000000e+00> : vector<1x10xf32>
    %148 = tpu.matmul %147, %146, %cst_106 {dimension_numbers = #tpu.dot_dimension_numbers<[1], [0], [0], [1], [0, 0, 1, 1], [], []>} : vector<1x84xbf16>, vector<84x10xbf16>, vector<1x10xf32> -> vector<1x10xf32>
    %c0_107 = arith.constant 0 : index
    %c0_108 = arith.constant 0 : index
    %149 = vector.load %arg15[%c0_107, %c0_108] : memref<1x10xf32, #tpu.memory_space<vmem>>, vector<1x10xf32>
    %150 = arith.addf %148, %149 : vector<1x10xf32>
    %c0_109 = arith.constant 0 : index
    %c0_110 = arith.constant 0 : index
    %c0_111 = arith.constant 0 : index
    %151 = vector.load %arg16[%c0_109, %c0_110, %c0_111] : memref<1x1x10xf32, #tpu.memory_space<vmem>>, vector<1x1x10xf32>
    %152 = vector.shape_cast %151 : vector<1x1x10xf32> to vector<1x10xf32>
    %153 = vector.shape_cast %150 : vector<1x10xf32> to vector<1x1x10xf32>
    tpu.vector_store %arg16[%c0_109, %c0_110, %c0_111], %153 {strides = array<i32>} : memref<1x1x10xf32, #tpu.memory_space<vmem>>, vector<1x1x10xf32>,
    return
  }
  func.func @transform_0(%arg0: i32) -> (i32, i32, i32) {
    %c0_i32 = arith.constant 0 : i32
    %c0_i32_0 = arith.constant 0 : i32
    %c0_i32_1 = arith.constant 0 : i32
    return %arg0, %c0_i32, %c0_i32_0 : i32, i32, i32
  }
  func.func @transform_1(%arg0: i32) -> (i32, i32, i32) {
    %c0_i32 = arith.constant 0 : i32
    %c0_i32_0 = arith.constant 0 : i32
    %c0_i32_1 = arith.constant 0 : i32
    %c0_i32_2 = arith.constant 0 : i32
    return %c0_i32, %c0_i32_0, %c0_i32_1 : i32, i32, i32
  }
  func.func @transform_2(%arg0: i32) -> (i32, i32) {
    %c0_i32 = arith.constant 0 : i32
    %c0_i32_0 = arith.constant 0 : i32
    %c0_i32_1 = arith.constant 0 : i32
    return %c0_i32, %c0_i32_0 : i32, i32
  }
  func.func @transform_3(%arg0: i32) -> (i32, i32, i32) {
    %c0_i32 = arith.constant 0 : i32
    %c0_i32_0 = arith.constant 0 : i32
    %c0_i32_1 = arith.constant 0 : i32
    %c0_i32_2 = arith.constant 0 : i32
    return %c0_i32, %c0_i32_0, %c0_i32_1 : i32, i32, i32
  }
  func.func @transform_4(%arg0: i32) -> (i32, i32, i32) {
    %c0_i32 = arith.constant 0 : i32
    %c0_i32_0 = arith.constant 0 : i32
    %c0_i32_1 = arith.constant 0 : i32
    %c0_i32_2 = arith.constant 0 : i32
    return %c0_i32, %c0_i32_0, %c0_i32_1 : i32, i32, i32
  }
  func.func @transform_5(%arg0: i32) -> (i32, i32, i32) {
    %c0_i32 = arith.constant 0 : i32
    %c0_i32_0 = arith.constant 0 : i32
    %c0_i32_1 = arith.constant 0 : i32
    %c0_i32_2 = arith.constant 0 : i32
    return %c0_i32, %c0_i32_0, %c0_i32_1 : i32, i32, i32
  }
  func.func @transform_6(%arg0: i32) -> (i32, i32) {
    %c0_i32 = arith.constant 0 : i32
    %c0_i32_0 = arith.constant 0 : i32
    %c0_i32_1 = arith.constant 0 : i32
    return %c0_i32, %c0_i32_0 : i32, i32
  }
  func.func @transform_7(%arg0: i32) -> (i32, i32, i32) {
    %c0_i32 = arith.constant 0 : i32
    %c0_i32_0 = arith.constant 0 : i32
    %c0_i32_1 = arith.constant 0 : i32
    %c0_i32_2 = arith.constant 0 : i32
    return %c0_i32, %c0_i32_0, %c0_i32_1 : i32, i32, i32
  }
  func.func @transform_8(%arg0: i32) -> (i32, i32, i32) {
    %c0_i32 = arith.constant 0 : i32
    %c0_i32_0 = arith.constant 0 : i32
    %c0_i32_1 = arith.constant 0 : i32
    %c0_i32_2 = arith.constant 0 : i32
    return %c0_i32, %c0_i32_0, %c0_i32_1 : i32, i32, i32
  }
  func.func @transform_9(%arg0: i32) -> (i32, i32, i32) {
    %c0_i32 = arith.constant 0 : i32
    %c0_i32_0 = arith.constant 0 : i32
    %c0_i32_1 = arith.constant 0 : i32
    %c0_i32_2 = arith.constant 0 : i32
    return %c0_i32, %c0_i32_0, %c0_i32_1 : i32, i32, i32
  }
  func.func @transform_10(%arg0: i32) -> (i32, i32) {
    %c0_i32 = arith.constant 0 : i32
    %c0_i32_0 = arith.constant 0 : i32
    %c0_i32_1 = arith.constant 0 : i32
    return %c0_i32, %c0_i32_0 : i32, i32
  }
  func.func @transform_11(%arg0: i32) -> (i32, i32) {
    %c0_i32 = arith.constant 0 : i32
    %c0_i32_0 = arith.constant 0 : i32
    %c0_i32_1 = arith.constant 0 : i32
    return %c0_i32, %c0_i32_0 : i32, i32
  }
  func.func @transform_12(%arg0: i32) -> (i32, i32) {
    %c0_i32 = arith.constant 0 : i32
    %c0_i32_0 = arith.constant 0 : i32
    %c0_i32_1 = arith.constant 0 : i32
    return %c0_i32, %c0_i32_0 : i32, i32
  }
  func.func @transform_13(%arg0: i32) -> (i32, i32) {
    %c0_i32 = arith.constant 0 : i32
    %c0_i32_0 = arith.constant 0 : i32
    %c0_i32_1 = arith.constant 0 : i32
    return %c0_i32, %c0_i32_0 : i32, i32
  }
  func.func @transform_14(%arg0: i32) -> (i32, i32) {
    %c0_i32 = arith.constant 0 : i32
    %c0_i32_0 = arith.constant 0 : i32
    %c0_i32_1 = arith.constant 0 : i32
    return %c0_i32, %c0_i32_0 : i32, i32
  }
  func.func @transform_15(%arg0: i32) -> (i32, i32, i32) {
    %c0_i32 = arith.constant 0 : i32
    %c0_i32_0 = arith.constant 0 : i32
    %c0_i32_1 = arith.constant 0 : i32
    return %arg0, %c0_i32, %c0_i32_0 : i32, i32, i32
  }
}

</mosaic_0001>

<bundles_post_ra>
// kernel: small_model_forward.1
= control target key start
LH: loop header
LB: loop body
LE: loop exit
PB: predicated region body
PF: predicated region fallthrough
CT: control target
= control target key end

     0   :  { %s5313_s0 = inlined_call_operand.vmem [shape: f32[2,32,96], index: 0, kind: input, shape index: {}]   ;;  %s5314_s1 = inlined_call_operand.vmem [shape: bf16[5,96,168], index: 1, kind: input, shape index: {}]   ;;  %s5315_s2 = inlined_call_operand.vmem [shape: f32[1,168], index: 2, kind: input, shape index: {}]   ;;  %s5316_s3 = inlined_call_operand.vmem [shape: bf16[2,168,84], index: 3, kind: input, shape index: {}]   ;;  %s5317_s4 = inlined_call_operand.vmem [shape: bf16[2,14,28], index: 4, kind: input, shape index: {}]   ;;  %s5318_s5 = inlined_call_operand.vmem [shape: bf16[5,84,160], index: 5, kind: input, shape index: {}]   ;;  %s5319_s6 = inlined_call_operand.vmem [shape: f32[1,160], index: 6, kind: input, shape index: {}]   ;;  %s5320_s7 = inlined_call_operand.vmem [shape: bf16[2,160,80], index: 7, kind: input, shape index: {}]   ;;  %s5321_s8 = inlined_call_operand.vmem [shape: bf16[2,5,10], index: 8, kind: input, shape index: {}]   ;;  %s5322_s9 = inlined_call_operand.vmem [shape: bf16[5,80,120], index: 9, kind: input, shape index: {}]   ;;  %s5323_s10 = inlined_call_operand.vmem [shape: f32[1,120], index: 10, kind: input, shape index: {}]   ;;  %s5324_s11 = inlined_call_operand.vmem [shape: bf16[120,84], index: 11, kind: input, shape index: {}]   ;;  %s5325_s12 = inlined_call_operand.vmem [shape: f32[1,84], index: 12, kind: input, shape index: {}]   ;;  %s5326_s13 = inlined_call_operand.vmem [shape: bf16[84,10], index: 13, kind: input, shape index: {}]   ;;  %s5327_s14 = inlined_call_operand.vmem [shape: f32[1,10], index: 14, kind: input, shape index: {}]   ;;  %s5328_s15 = inlined_call_operand.hbm [shape: f32[2,1,10], index: 15, kind: output, shape index: {}]  }
   0x1   :  { %5338 = sst [smem:[#allocation12_spill]] %s5328_s15 }
   0x2   :  { %20 = vsyncpa [#allocation3], 0 }
   0x3   :  { %22 = vsyncpa [#allocation3 + $0x1], 0  ;;  %s4399_s18 = smov 0   ;;  %s4401_s19 = smov 0  }
   0x4   :  { %s4403_s20 = smov 0   ;;  %s4405_s21 = smov 0  }
   0x5 LB: > { %5339 = sst [smem:[#allocation5_spill]] %s4301_s18  ;;  %s4420_s22 = sadd.s32 4294967295, %s4313_s21   ;;  %s4313_s21 = sphi %s4405_s21, %s5353_s21   ;;  %s4309_s20 = sphi %s4403_s20, %s5355_s20   ;;  %s4305_s19 = sphi %s4401_s19, %s5357_s19   ;;  %s4301_s18 = sphi %s4399_s18, %s5356_s18  }
   0x6   : > { %5340 = sst [smem:[#allocation6_spill]] %s4309_s20  ;;  %s3337_s23 = sadd.s32 4294967294, %s4313_s21  }
   0x7   : > { %5341 = sst [smem:[#allocation7_spill]] %s4313_s21  ;;  %s4424_s24 = sadd.s32 1, %s4313_s21  }
   0x8   : > { %5342 = sst [smem:[#allocation8_spill]] %s4424_s24  ;;  %s355_s25 = sadd.s32 1, %s4309_s20 }
   0x9   : > { %s352_s26 = ssub.s32 %s4313_s21, %s4424_s24  ;;  %p365_p0 = scmp.ne.s32.totalorder %s4309_s20, %s4305_s19 }
   0xa   : > { %p353_p1 = scmp.eq.s32.totalorder %s352_s26, 0  ;;  %p366_p2 = scmp.eq.s32.totalorder %s4420_s22, 1 }
   0xb   : > { %p371_p3 = scmp.ne.s32.totalorder %s4305_s19, %s4301_s18  ;;  %p372_p4 = scmp.eq.s32.totalorder %s3337_s23, 1 }
   0xc   : > { %s4435_s27 = scalar_select %p353_p1, %s4309_s20, %s355_s25  }
   0xd   : > { %p4437_p5 = por %p366_p2, %p365_p0  ;;  %p4441_p6 = por %p372_p4, %p371_p3 }
   0xe   : > { %5343 = sst [smem:[#allocation9_spill]] %s4435_s27  ;;  %p3340_p7 = scmp.ge.s32.totalorder %s4313_s21, 1 }
   0xf   : > { %s5344_s28 = scalar_select %p4437_p5, 1, 0 }
  0x10   : > { %s5346_s29 = scalar_select %p4441_p6, 1, 0 }
  0x11   : > { %5345 = sst [smem:[#allocation10_spill]] %s5344_s28  ;;  %p440_p8 = scmp.lt.s32.totalorder %s4313_s21, 3 }
  0x12   : > { %5347 = sst [smem:[#allocation11_spill]] %s5346_s29 }
  0x13   : > { %p441_p9 = pnand %p3340_p7, %p440_p8 }
  0x14   : > { %p487_p10 = scmp.lt.s32.totalorder (!%p441_p9), %s4420_s22, 1  ;;  %s485_s15 = sand.u32 (!%p441_p9), 1, %s4305_s19  }
  0x15   : > { %444 = sbr.rel (%p441_p9) target bundleno = 2057 (0x809), region = 80  ;;  %s3759_s20 = sshll.u32 (!%p441_p9), %s4420_s22, 4 }
  0x16   : > { %s486_s27 = scalar_lea.vmem (!%p441_p9), [#allocation2], %s485_s15  ;;  %s5349_s17 = sld [smem:[#allocation12_spill]] (!%p441_p9) }
  0x17   : > { %s3270_s24 = scalar_lea.sflag (!%p441_p9), [#allocation3], %s485_s15  ;;  %s4318_s29 = smov (!%p441_p9), [#allocation2]  }
  0x18   : > { %s4257_s25 = sshll.u32 (!%p441_p9), %s4318_s29, 4  ;;  %s4258_s25 = int_to_ptr.vmem [resolvable:$false] %s4257_s25 }
  0x19   : > { %s4259_s21 = scalar_lea.vmem (!%p441_p9), %s4258_s25, 32 }
  0x1a   : > { %v3995_v0 = vld [vmem:[%s5314_s1 + $0xb4] ss:$8 sps:$4 sm:$0xff]   ;;  %v4315_v2 = vmov 0   ;;  %v3999_v3 = vld [vmem:[%s5314_s1 + $0xb0] ss:$8 sps:$4 sm:$0xff]   ;;  %s488_s30 = scalar_select %p487_p10, %s4420_s22, 1 }
  0x1b   : > { %v3997_v1 = vld [vmem:[%s5314_s1 + $0x54] ss:$8 sps:$4 sm:$0xff]   ;;  %639 = vmatprep.mubr.bf16.mxu0 %v4315_v2  ;;  %756 = vmatprep.mubr.bf16.mxu1 %v4315_v2  ;;  %v4000_v4 = vld [vmem:[%s5314_s1 + $0x50] ss:$8 sps:$4 sm:$0xff]   ;;  %v4001_v5 = vld [vmem:[%s5314_s1 + $0xa4] ss:$8 sps:$4 sm:$0xff]  }
  0x1c   : > { %611 = vmatprep.subr.bf16.mxu0 %v3995_v0  ;;  %728 = vmatprep.subr.bf16.mxu1 %v3997_v1  ;;  %v4003_v6 = vld [vmem:[%s5314_s1 + $0x44] ss:$8 sps:$4 sm:$0xff]   ;;  %v4005_v7 = vld [vmem:[%s5314_s1 + $0xa0] ss:$8 sps:$4 sm:$0xff]   ;;  %v4007_v9 = vld [vmem:[%s5314_s1 + $0x94] ss:$8 sps:$4 sm:$0xff]   ;;  %s5272_s23 = scalar_lea.hbm %s5349_s17, %s3759_s20 }
  0x1d   : > { %612 = vmatpush1.bf16.msra.mxu0 %v3999_v3  ;;  %729 = vmatpush1.bf16.msra.mxu1 %v4000_v4  ;;  %v4006_v8 = vld [vmem:[%s5314_s1 + $0x40] ss:$8 sps:$4 sm:$0xff]   ;;  %v4009_v10 = vld [vmem:[%s5314_s1 + $0x34] ss:$8 sps:$4 sm:$0xff]   ;;  %v4011_v11 = vld [vmem:[%s5314_s1 + $0x90] ss:$8 sps:$4 sm:$0xff]  }
  0x1e   : > { %613 = vmatprep.subr.bf16.mxu0 %v4001_v5  ;;  %730 = vmatprep.subr.bf16.mxu1 %v4003_v6  ;;  %v4012_v12 = vld [vmem:[%s5314_s1 + $0x30] ss:$8 sps:$4 sm:$0xff]   ;;  %v4013_v13 = vld [vmem:[%s5314_s1 + $0x84] ss:$8 sps:$4 sm:$0xff]   ;;  %s3762_s18 = sshll.u32 %s488_s30, 5  ;;  %vm600_vm1 = vcmask 785408  }
  0x1f   : > { %v4015_v14 = vld [vmem:[%s5314_s1 + $0x24] ss:$8 sps:$4 sm:$0xff]   ;;  %v4017_v15 = vld [vmem:[%s5314_s1 + $0x80] ss:$8 sps:$4 sm:$0xff]   ;;  %v4019_v17 = vld [vmem:[%s5314_s1 + $0x74] ss:$8 sps:$4 sm:$0xff]   ;;  %s491_s16 = scalar_lea.vmem %s5313_s0, %s3762_s18 }
  0x20   : > { %v4018_v16 = vld [vmem:[%s5314_s1 + $0x20] ss:$8 sps:$4 sm:$0xff]   ;;  %v4021_v18 = vld [vmem:[%s5314_s1 + $0x14] ss:$8 sps:$4 sm:$0xff]   ;;  %v4023_v19 = vld [vmem:[%s5314_s1 + $0x70] ss:$8 sps:$4 sm:$0xff]  }
  0x21   : > { %614 = vmatpush1.bf16.msra.mxu0 %v4005_v7  ;;  %731 = vmatpush1.bf16.msra.mxu1 %v4006_v8  ;;  %v4024_v20 = vld [vmem:[%s5314_s1 + $0x10] ss:$8 sps:$4 sm:$0xff]   ;;  %v4025_v21 = vld [vmem:[%s5314_s1 + $0x64] ss:$8 sps:$4 sm:$0xff]   ;;  %v4029_v31 = vld [vmem:[%s5314_s1 + $0x60] ss:$8 sps:$4 sm:$0xff]  }
  0x22   : > { %615 = vmatprep.subr.bf16.mxu0 %v4007_v9  ;;  %732 = vmatprep.subr.bf16.mxu1 %v4009_v10  ;;  %v4027_v22 = vld [vmem:[%s5314_s1 + $0x4] ss:$8 sps:$4 sm:$0xff]   ;;  %v495_v25 = vld [vmem:[%s491_s16 + $0x10] sm:$0xff]  ;;  %v496_v26 = vld [vmem:[%s491_s16 + $0x18] sm:$0xff]  ;;  %vm524_vm0 = vsmask.f32 7424 }
  0x23   : > { %v493_v23 = vld [vmem:[%s491_s16] sm:$0xff]  ;;  %v494_v24 = vld [vmem:[%s491_s16 + $0x8] sm:$0xff]  ;;  %v4522_v28 = vpack.c.bf16 %v496_v26, %v495_v25  ;;  %v4033_v35 = vld [vmem:[%s5314_s1 + $0x114] ss:$8 sps:$4 sm:$0xff]   ;;  %vm792_vm2 = vcmask 1046528   ;;  %vm1084_vm4 = vcmask 1045504  }
  0x24   : > { %v4520_v27 = vpack.c.bf16 %v494_v24, %v493_v23  ;;  %v4030_v32 = vld [vmem:[%s5314_s1] ss:$8 sps:$4 sm:$0xff]   ;;  %v4036_v36 = vld [vmem:[%s5314_s1 + $0x174] ss:$8 sps:$4 sm:$0xff]   ;;  %v4031_v39 = vld [vmem:[%s5314_s1 + $0x110] ss:$8 sps:$4 sm:$0xff]  }
  0x25   : > { %616 = vmatpush1.bf16.msra.mxu0 %v4011_v11  ;;  %733 = vmatpush1.bf16.msra.mxu1 %v4012_v12  ;;  %v533_v33 = vshll.u32 %v4522_v28, 16  ;;  %v4034_v40 = vld [vmem:[%s5314_s1 + $0x170] ss:$8 sps:$4 sm:$0xff]   ;;  %v4039_v42 = vld [vmem:[%s5314_s1 + $0x104] ss:$8 sps:$4 sm:$0xff]   ;;  %v537_v45 = vshrl.u32 %v4522_v28, 16 }
  0x26   : > { %617 = vmatprep.subr.bf16.mxu0 %v4013_v13  ;;  %734 = vmatprep.subr.bf16.mxu1 %v4015_v14  ;;  %v526_v29 = vshrl.u32 %v4520_v27, 16  ;;  %v528_v30 = vshll.u32 %v4520_v27, 16  ;;  %v4042_v43 = vld [vmem:[%s5314_s1 + $0x164] ss:$8 sps:$4 sm:$0xff]   ;;  %v4037_v44 = vld [vmem:[%s5314_s1 + $0x100] ss:$8 sps:$4 sm:$0xff]  }
  0x27   : > { %v535_v37 = vrot.slane %v533_v33, 1  ;;  %v4040_v46 = vld [vmem:[%s5314_s1 + $0x160] ss:$8 sps:$4 sm:$0xff]   ;;  %v4045_v47 = vld [vmem:[%s5314_s1 + $0xf4] ss:$8 sps:$4 sm:$0xff]   ;;  %v941_v60 = vrot.slane %v533_v33, 2 }
  0x28   : > { %v530_v34 = vrot.slane %v528_v30, 1  ;;  %v4048_v48 = vld [vmem:[%s5314_s1 + $0x154] ss:$8 sps:$4 sm:$0xff]   ;;  %v4043_v49 = vld [vmem:[%s5314_s1 + $0xf0] ss:$8 sps:$4 sm:$0xff]   ;;  %v937_v58 = vrot.slane %v526_v29, 1 }
  0x29   : > { %618 = vmatpush1.bf16.msra.mxu0 %v4017_v15  ;;  %735 = vmatpush1.bf16.msra.mxu1 %v4018_v16  ;;  %v539_v50 = vor.u32 %v537_v45, %v535_v37  ;;  %v4046_v51 = vld [vmem:[%s5314_s1 + $0x150] ss:$8 sps:$4 sm:$0xff]   ;;  %v4051_v52 = vld [vmem:[%s5314_s1 + $0xe4] ss:$8 sps:$4 sm:$0xff]   ;;  %v4049_v54 = vld [vmem:[%s5314_s1 + $0xe0] ss:$8 sps:$4 sm:$0xff]  }
  0x2a   : > { %619 = vmatprep.subr.bf16.mxu0 %v4019_v17  ;;  %736 = vmatprep.subr.bf16.mxu1 %v4021_v18  ;;  %v531_v38 = vor.u32 %v530_v34, %v526_v29  ;;  %v4054_v53 = vld [vmem:[%s5314_s1 + $0x144] ss:$8 sps:$4 sm:$0xff]   ;;  %v4052_v55 = vld [vmem:[%s5314_s1 + $0x140] ss:$8 sps:$4 sm:$0xff]   ;;  %v4057_v56 = vld [vmem:[%s5314_s1 + $0xd4] ss:$8 sps:$4 sm:$0xff]  }
  0x2b   : > { %v4060_v57 = vld [vmem:[%s5314_s1 + $0x134] ss:$8 sps:$4 sm:$0xff]   ;;  %v938_v59 = vrot.slane %v528_v30, 2  ;;  %vm936_vm3 = vsmask.f32 6400  ;;  %v793_v62 = vrot.slane %v4520_v27, 1 }
  0x2c   : > { %v536_v41 = vsel %vm524_vm0, %v531_v38, %v535_v37  ;;  %v4055_v61 = vld [vmem:[%s5314_s1 + $0xd0] ss:$8 sps:$4 sm:$0xff]   ;;  %v940_v63 = vrot.slane %v537_v45, 1  ;;  %v794_v1 = vrot.slane %v4522_v28, 1  ;;  %v4063_v3 = vld [vmem:[%s5314_s1 + $0xc4] ss:$8 sps:$4 sm:$0xff]  }
  0x2d   : > { %620 = vmatpush1.bf16.msra.mxu0 %v4023_v19  ;;  %737 = vmatpush1.bf16.msra.mxu1 %v4024_v20  ;;  %v4058_v0 = vld [vmem:[%s5314_s1 + $0x130] ss:$8 sps:$4 sm:$0xff]   ;;  %v4066_v4 = vld [vmem:[%s5314_s1 + $0x124] ss:$8 sps:$4 sm:$0xff]   ;;  %v4061_v5 = vld [vmem:[%s5314_s1 + $0xc0] ss:$8 sps:$4 sm:$0xff]   ;;  %v939_v8 = vor.u32 %v938_v59, %v937_v58 }
  0x2e   : > { %621 = vmatprep.subr.bf16.mxu0 %v4025_v21  ;;  %738 = vmatprep.subr.bf16.mxu1 %v4027_v22  ;;  %v4064_v6 = vld [vmem:[%s5314_s1 + $0x120] ss:$8 sps:$4 sm:$0xff]   ;;  %v4069_v7 = vld [vmem:[%s5314_s1 + $0x1d4] ss:$8 sps:$4 sm:$0xff]   ;;  %v942_v9 = vor.u32 %v941_v60, %v940_v63  ;;  %v4067_v10 = vld [vmem:[%s5314_s1 + $0x1d0] ss:$8 sps:$4 sm:$0xff]   ;;  %v795_v12 = vsel %vm792_vm2, %v793_v62, %v794_v1 }
  0x2f   : > { %v4072_v11 = vld [vmem:[%s5314_s1 + $0x1c4] ss:$8 sps:$4 sm:$0xff]   ;;  %v4070_v14 = vld [vmem:[%s5314_s1 + $0x1c0] ss:$8 sps:$4 sm:$0xff]   ;;  %v4075_v15 = vld [vmem:[%s5314_s1 + $0x1b4] ss:$8 sps:$4 sm:$0xff]  }
  0x30   : > { %v943_v13 = vsel %vm936_vm3, %v939_v8, %v942_v9  ;;  %v4073_v16 = vld [vmem:[%s5314_s1 + $0x1b0] ss:$8 sps:$4 sm:$0xff]   ;;  %v4078_v17 = vld [vmem:[%s5314_s1 + $0x1a4] ss:$8 sps:$4 sm:$0xff]   ;;  %v4076_v18 = vld [vmem:[%s5314_s1 + $0x1a0] ss:$8 sps:$4 sm:$0xff]  }
  0x31   : > { %622 = vmatpush1.bf16.msra.mxu0 %v4029_v31  ;;  %739 = vmatpush1.bf16.msra.mxu1 %v4030_v32  ;;  %v4081_v19 = vld [vmem:[%s5314_s1 + $0x194] ss:$8 sps:$4 sm:$0xff]   ;;  %v4079_v20 = vld [vmem:[%s5314_s1 + $0x190] ss:$8 sps:$4 sm:$0xff]   ;;  %v4084_v21 = vld [vmem:[%s5314_s1 + $0x184] ss:$8 sps:$4 sm:$0xff]  }
  0x32   : > { %866 = vmatprep.subr.bf16.mxu0 %v4033_v35  ;;  %1014 = vmatprep.subr.bf16.mxu1 %v4036_v36  ;;  %v4082_v22 = vld [vmem:[%s5314_s1 + $0x180] ss:$8 sps:$4 sm:$0xff]   ;;  %v1085_v23 = vrot.slane %v4520_v27, 2  ;;  %v1086_v24 = vrot.slane %v4522_v28, 2  ;;  %v4085_v26 = vld [vmem:[%s5316_s3 + $0x38] sm:$0xff]   ;;  %v4094_v35 = vld [vmem:[%s5316_s3 + $0x6c] sm:$0xff]  }
  0x33   : > { %v4088_v29 = vld [vmem:[%s5316_s3 + $0x84] sm:$0xff]   ;;  %v4090_v31 = vld [vmem:[%s5316_s3 + $0x7c] sm:$0xff]   ;;  %v4092_v33 = vld [vmem:[%s5316_s3 + $0x74] sm:$0xff]   ;;  %vm1338_vm5 = vcmask 1043456   ;;  %vm1331_vm6 = vcmask 326656   ;;  %vm4317_vm7 = vmmov 0  }
  0x34   : > { %3367 = vmatmul.mubr.msk.bf16.vlgmr.msra.gmra.mxu0 %vm600_vm1, %v536_v41  ;;  %3381 = vmatmul.mubr.msk.bf16.vlgmr.msra.gmra.mxu1 %vm600_vm1, %v4520_v27  ;;  %v1087_v25 = vsel %vm1084_vm4, %v1085_v23, %v1086_v24  ;;  %v4086_v27 = vld [vmem:[%s5316_s3 + $0x8c] sm:$0xff]   ;;  %v4091_v32 = vld [vmem:[%s5316_s3 + $0x20] sm:$0xff]   ;;  %v4093_v34 = vld [vmem:[%s5316_s3 + $0x18] sm:$0xff]   ;;  %vm1734_vm8 = vcmask 1041408   ;;  %vm1541_vm9 = vcmask 228352   ;;  %vm1730_vm10 = vcmask 687104  }
  0x35   : > { %867 = vmatpush1.bf16.msra.mxu0 %v4031_v39  ;;  %1015 = vmatpush1.bf16.msra.mxu1 %v4034_v40  ;;  %v4089_v30 = vld [vmem:[%s5316_s3 + $0x28] sm:$0xff]   ;;  %v4095_v36 = vld [vmem:[%s5316_s3 + $0x10] sm:$0xff]   ;;  %v4098_v39 = vld [vmem:[%s5316_s3 + $0x5c] sm:$0xff]   ;;  %vm2367_vm11 = vcmask 261120   ;;  %vm2542_vm12 = vcmask 1044480   ;;  %vm2538_vm13 = vcmask 80896  }
  0x36   : > { %868 = vmatprep.subr.bf16.mxu0 %v4039_v42  ;;  %1016 = vmatprep.subr.bf16.mxu1 %v4042_v43  ;;  %v4096_v37 = vld [vmem:[%s5316_s3 + $0x64] sm:$0xff]   ;;  %v4100_v41 = vld [vmem:[%s5316_s3 + $0x54] sm:$0xff]   ;;  %v4101_v42 = vld [vmem:[%s5316_s3 + $0x50] ss:$0 sps:$4 sm:$0xff]   ;;  %vm2687_vm14 = vcmask 654336   ;;  %vm3127_vm15 = vcmask 982016  }
  0x37   : > { %649 = vmatprep.mubr.bf16.mxu0 %v4315_v2  ;;  %766 = vmatprep.mubr.bf16.mxu1 %v4315_v2  ;;  %v4097_v38 = vld [vmem:[%s5316_s3 + $0x8] sm:$0xff]   ;;  %v4099_v40 = vld [vmem:[%s5316_s3] sm:$0xff]   ;;  %s3282_s30 = sshll.u32 %s486_s27, 4  ;;  %vm3267_vm0 = vcmask 73728   ;;  %s5274_s30 = int_to_ptr.vmem [resolvable:$true] %s3282_s30 }
  0x38   : > { %v4102_v43 = vld [vmem:[%s5316_s3 + $0xa4] ss:$0 sps:$4 sm:$0xff]   ;;  %s4253_s22 = scalar_lea.vmem %s5274_s30, 16  ;;  %p4260_p0 = scmp.lt.s32.totalorder %s5274_s30, %s4258_s25 }
  0x39   : > { %869 = vmatpush1.bf16.msra.mxu0 %v4037_v44  ;;  %1017 = vmatpush1.bf16.msra.mxu1 %v4040_v46  ;;  %v1340_v44 = vsel %vm1338_vm5, %v4101_v42, 0  ;;  %v1477_v45 = vsel %vm1338_vm5, %v4102_v43, 0  ;;  %v4103_v46 = vld [vmem:[%s5316_s3 + $0x48] sm:$0xff]   ;;  %p4254_p11 = scmp.ne.s32.totalorder %s5274_s30, %s4253_s22  ;;  %p4261_p1 = scmp.lt.s32.totalorder %s4259_s21, %s4253_s22 }
  0x3a   : > { %870 = vmatprep.subr.bf16.mxu0 %v4045_v47  ;;  %1018 = vmatprep.subr.bf16.mxu1 %v4048_v48  ;;  %v4104_v47 = vld [vmem:[%s5316_s3 + $0x9c] sm:$0xff]  }
  0x3b   : > { %v4105_v48 = vld [vmem:[%s5316_s3 + $0x40] sm:$0xff]   ;;  %p4255_p12 = pnand %p4254_p11, %p4437_p5  ;;  %p4262_p2 = por %p4261_p1, %p4260_p0 }
  0x3c   : > { %3368 = vmatmul.mubr.msk.bf16.gmra.mxu0 %vm600_vm1, %v539_v50  ;;  %3382 = vmatmul.mubr.msk.bf16.gmra.mxu1 %vm600_vm1, %v4522_v28  ;;  %v4087_v28 = vld [vmem:[%s5316_s3 + $0x30] sm:$0xff]  }
  0x3d   : > { %871 = vmatpush1.bf16.msra.mxu0 %v4043_v49  ;;  %1019 = vmatpush1.bf16.msra.mxu1 %v4046_v51  ;;  %v4106_v49 = vld [vmem:[%s5316_s3 + $0x94] sm:$0xff]   ;;  %p4256_p13 = pneg %p4255_p12 }
  0x3e   : > { %872 = vmatprep.subr.bf16.mxu0 %v4051_v52  ;;  %1020 = vmatprep.subr.bf16.mxu1 %v4054_v53 }
  0x3f   : > { %894 = vmatprep.mubr.bf16.mxu0 %v4315_v2  ;;  %1042 = vmatprep.mubr.bf16.mxu1 %v4315_v2  ;;  %p4263_p3 = pnand %p4262_p2, %p4256_p13 }
  0x41   : > { %873 = vmatpush1.bf16.msra.mxu0 %v4049_v54  ;;  %1021 = vmatpush1.bf16.msra.mxu1 %v4052_v55 }
  0x42   : > { %874 = vmatprep.subr.bf16.mxu0 %v4057_v56  ;;  %1022 = vmatprep.subr.bf16.mxu1 %v4060_v57 }
  0x45   : > { %875 = vmatpush1.bf16.msra.mxu0 %v4055_v61  ;;  %1023 = vmatpush1.bf16.msra.mxu1 %v4058_v0 }
  0x46   : > { %876 = vmatprep.subr.bf16.mxu0 %v4063_v3  ;;  %1024 = vmatprep.subr.bf16.mxu1 %v4066_v4 }
  0x49   : > { %877 = vmatpush1.bf16.msra.mxu0 %v4061_v5  ;;  %1025 = vmatpush1.bf16.msra.mxu1 %v4064_v6 }
  0x4a   : > { %1158 = vmatprep.subr.bf16.mxu0 %v4069_v7  ;;  %1342 = vmatprep.subr.bf16.mxu1 %v4315_v2 }
  0x4c   : > { %3407 = vmatmul.mubr.msk.bf16.vlgmr.msra.gmra.mxu0 %vm600_vm1, %v795_v12  ;;  %3433 = vmatmul.mubr.msk.bf16.vlgmr.msra.gmra.mxu1 %vm600_vm1, %v943_v13  ;;  %v1217_v12 = vlaneseq }
  0x4d   : > { %1159 = vmatpush1.bf16.msra.mxu0 %v4067_v10  ;;  %904 = vmatprep.mubr.bf16.mxu0 %v4315_v2 }
  0x4e   : > { %1160 = vmatprep.subr.bf16.mxu0 %v4072_v11  ;;  %1052 = vmatprep.mubr.bf16.mxu1 %v4315_v2 }
  0x4f   : > { %1343 = vmatpush1.bf16.msra.mxu1 %v4085_v26 }
  0x50   : > { %1344 = vmatprep.subr.bf16.mxu1 %v4315_v2 }
  0x51   : > { %1161 = vmatpush1.bf16.msra.mxu0 %v4070_v14 }
  0x52   : > { %1162 = vmatprep.subr.bf16.mxu0 %v4075_v15 }
  0x53   : > { %1345 = vmatpush1.bf16.msra.mxu1 %v4087_v28 }
  0x54   : > { %3408 = vmatmul.mubr.msk.bf16.gmra.mxu0 %vm600_vm1, %v794_v1  ;;  %3434 = vmatmul.mubr.msk.bf16.gmra.mxu1 %vm600_vm1, %v942_v9 }
  0x55   : > { %1163 = vmatpush1.bf16.msra.mxu0 %v4073_v16  ;;  %1186 = vmatprep.mubr.bf16.mxu0 %v4315_v2 }
  0x56   : > { %1164 = vmatprep.subr.bf16.mxu0 %v4078_v17  ;;  %1346 = vmatprep.subr.bf16.mxu1 %v4315_v2  ;;  %v4759_v17 = vshrl.u32 %v1217_v12, 7 }
  0x57   : > { %1347 = vmatpush1.bf16.msra.mxu1 %v4089_v30  ;;  %v1215_v30 = vld [vmem:[%s5315_s2] sm:$0x3] }
  0x58   : > { %1348 = vmatprep.subr.bf16.mxu1 %v4315_v2 }
  0x59   : > { %1165 = vmatpush1.bf16.msra.mxu0 %v4076_v18 }
  0x5a   : > { %1166 = vmatprep.subr.bf16.mxu0 %v4081_v19 }
  0x5b   : > { %1349 = vmatpush1.bf16.msra.mxu1 %v4091_v32 }
  0x5c   : > { %1350 = vmatprep.subr.bf16.mxu1 %v4315_v2 }
  0x5d   : > { %1167 = vmatpush1.bf16.msra.mxu0 %v4079_v20 }
  0x5e   : > { %1168 = vmatprep.subr.bf16.mxu0 %v4084_v21 }
  0x5f   : > { %1351 = vmatpush1.bf16.msra.mxu1 %v4093_v34 }
  0x60   : > { %1352 = vmatprep.subr.bf16.mxu1 %v4315_v2 }
  0x61   : > { %1169 = vmatpush1.bf16.msra.mxu0 %v4082_v22 }
  0x62   : > { %1479 = vmatprep.subr.bf16.mxu0 %v4315_v2 }
  0x63   : > { %1353 = vmatpush1.bf16.msra.mxu1 %v4095_v36 }
  0x64   : > { %3459 = vmatmul.mubr.msk.bf16.vlgmr.msra.gmra.mxu0 %vm600_vm1, %v1087_v25  ;;  %1354 = vmatprep.subr.bf16.mxu1 %v4315_v2  ;;  %v1223_v25 = vsub.s32 1, %v4759_v17 }
  0x65   : > { %1196 = vmatprep.mubr.bf16.mxu0 %v4315_v2  ;;  %1480 = vmatpush1.bf16.msra.mxu0 %v4086_v27  ;;  %v1219_v27 = vsub.s32 0, %v4759_v17  ;;  %v4214_v17 = vld [vmem:[%s5322_s9 + $0x20] sm:$0xff]  }
  0x66   : > { %1481 = vmatprep.subr.bf16.mxu0 %v4315_v2 }
  0x67   : > { %1355 = vmatpush1.bf16.msra.mxu1 %v4097_v38 }
  0x68   : > { %1356 = vmatprep.subr.bf16.mxu1 %v4315_v2 }
  0x69   : > { %1482 = vmatpush1.bf16.msra.mxu0 %v4088_v29 }
  0x6a   : > { %1483 = vmatprep.subr.bf16.mxu0 %v4315_v2 }
  0x6b   : > { %1357 = vmatpush1.bf16.msra.mxu1 %v4099_v40  ;;  %v1220_v40 = vrot.slane %v1215_v30, %v1219_v27 }
  0x6c   : > { %3460 = vmatmul.mubr.msk.bf16.gmra.mxu0 %vm600_vm1, %v1086_v24  ;;  %1368 = vmatprep.subr.bf16.mxu1 %v4315_v2 }
  0x6d   : > { %1484 = vmatpush1.bf16.msra.mxu0 %v4090_v31 }
  0x6e   : > { %1485 = vmatprep.subr.bf16.mxu0 %v4315_v2 }
  0x6f   : > { %1369 = vmatpush2.bf16.msra.mxu1 %v1340_v44 }
  0x70   : > { %1370 = vmatprep.subr.bf16.mxu1 %v4315_v2 }
  0x71   : > { %1486 = vmatpush1.bf16.msra.mxu0 %v4092_v33 }
  0x72   : > { %1487 = vmatprep.subr.bf16.mxu0 %v4315_v2 }
  0x73   : > { %1371 = vmatpush2.bf16.msra.mxu1 %v4103_v46 }
  0x74   : > { %1372 = vmatprep.subr.bf16.mxu1 %v4315_v2 }
  0x75   : > { %1488 = vmatpush1.bf16.msra.mxu0 %v4094_v35 }
  0x76   : > { %1489 = vmatprep.subr.bf16.mxu0 %v4315_v2 }
  0x77   : > { %1373 = vmatpush2.bf16.msra.mxu1 %v4105_v48 }
  0x79   : > { %1490 = vmatpush1.bf16.msra.mxu0 %v4096_v37  ;;  %v1224_v37 = vrot.slane %v1215_v30, %v1223_v25 }
  0x7a   : > { %1491 = vmatprep.subr.bf16.mxu0 %v4315_v2 }
  0x7d   : > { %1492 = vmatpush1.bf16.msra.mxu0 %v4098_v39 }
  0x7e   : > { %1493 = vmatprep.subr.bf16.mxu0 %v4315_v2 }
  0x81   : > { %1494 = vmatpush1.bf16.msra.mxu0 %v4100_v41 }
  0x82   : > { %1505 = vmatprep.subr.bf16.mxu0 %v4315_v2 }
  0x85   : > { %1506 = vmatpush2.bf16.msra.mxu0 %v1477_v45 }
  0x86   : > { %1507 = vmatprep.subr.bf16.mxu0 %v4315_v2 }
  0x89   : > { %1508 = vmatpush2.bf16.msra.mxu0 %v4104_v47 }
  0x8a   : > { %1509 = vmatprep.subr.bf16.mxu0 %v4315_v2 }
  0x8d   : > { %1510 = vmatpush2.bf16.msra.mxu0 %v4106_v49 }
  0xf4   : > { %v641_v50 = vpop.f32.mrf.mxu0  ;;  %v758_v51 = vpop.f32.mrf.mxu1 }
  0xf5   : > { %v759_v16 = vadd.f32 %v758_v51, %v641_v50 }
  0xf6   : > { %v643_v52 = vpop.f32.mrf.mxu0  ;;  %v760_v54 = vpop.f32.mrf.mxu1 }
  0xf7   : > { %v761_v15 = vadd.f32 %v760_v54, %v643_v52 }
  0xf8   : > { %v645_v53 = vpop.f32.mrf.mxu0  ;;  %v762_v56 = vpop.f32.mrf.mxu1 }
  0xf9   : > { %v763_v18 = vadd.f32 %v762_v56, %v645_v53 }
  0xfa   : > { %v647_v55 = vpop.f32.mrf.mxu0  ;;  %v764_v58 = vpop.f32.mrf.mxu1 }
  0xfb   : > { %v765_v23 = vadd.f32 %v764_v58, %v647_v55 }
  0xfc   : > { %v651_v57 = vpop.f32.mrf.mxu0  ;;  %v768_v60 = vpop.f32.mrf.mxu1 }
  0xfd   : > { %v769_v38 = vadd.f32 %v768_v60, %v651_v57 }
  0xfe   : > { %v653_v59 = vpop.f32.mrf.mxu0  ;;  %v770_v62 = vpop.f32.mrf.mxu1 }
  0xff   : > { %v771_v34 = vadd.f32 %v770_v62, %v653_v59 }
 0x100   : > { %v655_v61 = vpop.f32.mrf.mxu0  ;;  %v772_v0 = vpop.f32.mrf.mxu1 }
 0x101   : > { %v773_v42 = vadd.f32 %v772_v0, %v655_v61 }
 0x102   : > { %v657_v63 = vpop.f32.mrf.mxu0  ;;  %v774_v4 = vpop.f32.mrf.mxu1 }
 0x103   : > { %v775_v46 = vadd.f32 %v774_v4, %v657_v63 }
 0x10c   : > { %v896_v1 = vpop.f32.mrf.mxu0  ;;  %v1044_v6 = vpop.f32.mrf.mxu1 }
 0x10d   : > { %v915_v20 = vadd.f32 %v896_v1, %v759_v16 }
 0x10e   : > { %v898_v3 = vpop.f32.mrf.mxu0  ;;  %v1046_v8 = vpop.f32.mrf.mxu1 }
 0x10f   : > { %v916_v19 = vadd.f32 %v898_v3, %v761_v15  ;;  %v1063_v31 = vadd.f32 %v1044_v6, %v915_v20 }
 0x110   : > { %v900_v5 = vpop.f32.mrf.mxu0  ;;  %v1048_v10 = vpop.f32.mrf.mxu1 }
 0x111   : > { %v917_v24 = vadd.f32 %v900_v5, %v763_v18  ;;  %v1064_v28 = vadd.f32 %v1046_v8, %v916_v19 }
 0x112   : > { %v902_v7 = vpop.f32.mrf.mxu0  ;;  %v1050_v13 = vpop.f32.mrf.mxu1 }
 0x113   : > { %v918_v29 = vadd.f32 %v902_v7, %v765_v23  ;;  %v1065_v35 = vadd.f32 %v1048_v10, %v917_v24  ;;  %v4316_v24 = vmov 0.0  }
 0x114   : > { %v906_v9 = vpop.f32.mrf.mxu0  ;;  %v1054_v21 = vpop.f32.mrf.mxu1  ;;  %3819 = vmatprep.subr.bf16.mxu1 %v4316_v24 }
 0x115   : > { %v1066_v43 = vadd.f32 %v1050_v13, %v918_v29  ;;  %v919_v47 = vadd.f32 %v906_v9, %v769_v38 }
 0x116   : > { %v908_v11 = vpop.f32.mrf.mxu0  ;;  %v1056_v32 = vpop.f32.mrf.mxu1 }
 0x117   : > { %v920_v44 = vadd.f32 %v908_v11, %v771_v34  ;;  %v1067_v59 = vadd.f32 %v1054_v21, %v919_v47 }
 0x118   : > { %v910_v14 = vpop.f32.mrf.mxu0  ;;  %v1058_v48 = vpop.f32.mrf.mxu1 }
 0x119   : > { %v921_v50 = vadd.f32 %v910_v14, %v773_v42  ;;  %v1068_v56 = vadd.f32 %v1056_v32, %v920_v44 }
 0x11a   : > { %v912_v22 = vpop.f32.mrf.mxu0  ;;  %v1060_v60 = vpop.f32.mrf.mxu1 }
 0x11b   : > { %v922_v57 = vadd.f32 %v912_v22, %v775_v46  ;;  %v1069_v0 = vadd.f32 %v1058_v48, %v921_v50 }
 0x11d   : > { %v1070_v7 = vadd.f32 %v1060_v60, %v922_v57  ;;  %v4113_v60 = vld [vmem:[%s5318_s5 + $0x44] ss:$8 sps:$4 sm:$0xff]  }
 0x124   : > { %v1188_v26 = vpop.f32.mrf.mxu0 }
 0x125   : > { %v1207_v39 = vadd.f32 %v1188_v26, %v1063_v31  ;;  %v3524_v26 = vld [vmem:[%s5318_s5 + $0xa8] sm:$0x33] }
 0x126   : > { %v1190_v33 = vpop.f32.mrf.mxu0  ;;  %v3535_v29 = vcombine.low %v3524_v26, %v3524_v26 }
 0x127   : > { %v1208_v36 = vadd.f32 %v1190_v33, %v1064_v28  ;;  %v1227_v54 = vadd.f32 %v1220_v40, %v1207_v39  ;;  %v3536_v28 = vcombine.high %v3524_v26, %v3524_v26 }
 0x128   : > { %v1192_v41 = vpop.f32.mrf.mxu0  ;;  %v1736_v30 = vsel %vm1734_vm8, %v3535_v29, 0 }
 0x129   : > { %v1209_v45 = vadd.f32 %v1192_v41, %v1065_v35  ;;  %v1228_v51 = vadd.f32 %v1224_v37, %v1208_v36  ;;  %v1235_v4 = vmax.f32 %v1227_v54, 0.0  ;;  %3537 = vmatprep.subr.msk.bf16.mxu0 %vm1734_vm8, %v3536_v28  ;;  %v4107_v54 = vld [vmem:[%s5317_s4] sm:$0x7f]  }
 0x12a   : > { %v1194_v49 = vpop.f32.mrf.mxu0 }
 0x12b   : > { %v1229_v52 = vadd.f32 %v1220_v40, %v1209_v45  ;;  %v1210_v53 = vadd.f32 %v1194_v49, %v1066_v43  ;;  %v1236_v1 = vmax.f32 %v1228_v51, 0.0 }
 0x12c   : > { %v1198_v55 = vpop.f32.mrf.mxu0 }
 0x12d   : > { %v1230_v58 = vadd.f32 %v1224_v37, %v1210_v53  ;;  %v1237_v62 = vmax.f32 %v1229_v52, 0.0  ;;  %v1211_v5 = vadd.f32 %v1198_v55, %v1067_v59  ;;  %v1654_v55 = vld [vmem:[%s5318_s5 + $0x50] sm:$0x33] }
 0x12e   : > { %v1200_v61 = vpop.f32.mrf.mxu0  ;;  %v3549_v57 = vcombine.low %v1654_v55, %v1654_v55 }
 0x12f   : > { %v1238_v3 = vmax.f32 %v1230_v58, 0.0  ;;  %v1212_v63 = vadd.f32 %v1200_v61, %v1068_v56  ;;  %v1264_v10 = vpack.c.bf16 %v1237_v62, %v1235_v4  ;;  %v1231_v15 = vadd.f32 %v1220_v40, %v1211_v5  ;;  %v4108_v58 = vld [vmem:[%s5317_s4 + $0x8] sm:$0x7f]   ;;  %v4118_v61 = vld [vmem:[%s5318_s5 + $0x34] ss:$8 sps:$4 sm:$0xff]  }
 0x130   : > { %v1202_v6 = vpop.f32.mrf.mxu0  ;;  %v3550_v56 = vcombine.high %v1654_v55, %v1654_v55  ;;  %v1842_v59 = vsel %vm1734_vm8, %v3549_v57, 0  ;;  %v4111_v62 = vld [vmem:[%s5318_s5 + $0x40] ss:$8 sps:$4 sm:$0xff]   ;;  %v4127_v5 = vld [vmem:[%s5318_s5 + $0x8c] ss:$8 sps:$4 sm:$0xff]  }
 0x131   : > { %v1265_v8 = vpack.c.bf16 %v1238_v3, %v1236_v1  ;;  %v1213_v9 = vadd.f32 %v1202_v6, %v1069_v0  ;;  %v1232_v12 = vadd.f32 %v1224_v37, %v1212_v63  ;;  %v1239_v21 = vmax.f32 %v1231_v15, 0.0  ;;  %v4116_v0 = vld [vmem:[%s5318_s5 + $0x30] ss:$8 sps:$4 sm:$0xff]   ;;  %v4121_v1 = vld [vmem:[%s5318_s5 + $0x9c] ss:$8 sps:$4 sm:$0xff]  }
 0x132   : > { %v1204_v11 = vpop.f32.mrf.mxu0  ;;  %v4119_v3 = vld [vmem:[%s5318_s5 + $0x98] ss:$8 sps:$4 sm:$0xff]   ;;  %v4124_v63 = vld [vmem:[%s5318_s5 + $0x24] ss:$8 sps:$4 sm:$0xff]   ;;  %v4125_v6 = vld [vmem:[%s5318_s5 + $0x88] ss:$8 sps:$4 sm:$0xff]  }
 0x133   : > { %v1233_v13 = vadd.f32 %v1220_v40, %v1213_v9  ;;  %v1214_v14 = vadd.f32 %v1204_v11, %v1070_v7  ;;  %3472 = vmatprep.mubr.msk.bf16.mxu1 %vm1331_vm6, %v1265_v8  ;;  %3506 = vmatprep.mubr.msk.bf16.mxu0 %vm1331_vm6, %v1265_v8  ;;  %v1240_v19 = vmax.f32 %v1232_v12, 0.0  ;;  %v4122_v4 = vld [vmem:[%s5318_s5 + $0x20] ss:$8 sps:$4 sm:$0xff]   ;;  %v4130_v7 = vld [vmem:[%s5318_s5 + $0x14] ss:$8 sps:$4 sm:$0xff]  }
 0x134   : > { %1375 = vmatmul.mubr.bf16.vlgmr.msra.gmra.mxu1 %v1264_v10  ;;  %1512 = vmatmul.mubr.bf16.vlgmr.msra.gmra.mxu0 %v1264_v10  ;;  %v4128_v8 = vld [vmem:[%s5318_s5 + $0x10] ss:$8 sps:$4 sm:$0xff]   ;;  %v4133_v9 = vld [vmem:[%s5318_s5 + $0x7c] ss:$8 sps:$4 sm:$0xff]   ;;  %v4134_v12 = vld [vmem:[%s5318_s5] ss:$8 sps:$4 sm:$0xff]  }
 0x135   : > { %v1234_v16 = vadd.f32 %v1224_v37, %v1214_v14  ;;  %v1241_v18 = vmax.f32 %v1233_v13, 0.0  ;;  %1746 = vmatpush1.bf16.msra.mxu0 %v1736_v30  ;;  %v4131_v10 = vld [vmem:[%s5318_s5 + $0x78] ss:$8 sps:$4 sm:$0xff]   ;;  %v4136_v11 = vld [vmem:[%s5318_s5 + $0x4] ss:$8 sps:$4 sm:$0xff]  }
 0x136   : > { %1747 = vmatprep.subr.bf16.mxu0 %v4121_v1  ;;  %v4139_v13 = vld [vmem:[%s5318_s5 + $0x6c] ss:$8 sps:$4 sm:$0xff]   ;;  %v4137_v14 = vld [vmem:[%s5318_s5 + $0x68] ss:$8 sps:$4 sm:$0xff]   ;;  %v3588_v15 = vld [vmem:[%s5318_s5 + $0x158] sm:$0x33] }
 0x137   : > { %v1242_v20 = vmax.f32 %v1234_v16, 0.0  ;;  %v1266_v23 = vpack.c.bf16 %v1241_v18, %v1239_v21  ;;  %v3600_v16 = vcombine.high %v3588_v15, %v3588_v15  ;;  %v4144_v18 = vld [vmem:[%s5318_s5 + $0x5c] ss:$8 sps:$4 sm:$0xff]   ;;  %v4170_v57 = vld [vmem:[%s5318_s5 + $0x10c] ss:$8 sps:$4 sm:$0xff]  }
 0x138   : > { %v4167_v55 = vld [vmem:[%s5318_s5 + $0xd4] ss:$8 sps:$4 sm:$0xff]  }
 0x139   : > { %v1267_v22 = vpack.c.bf16 %v1242_v20, %v1240_v19  ;;  %1748 = vmatpush1.bf16.msra.mxu0 %v4119_v3  ;;  %v4142_v19 = vld [vmem:[%s5318_s5 + $0x58] ss:$8 sps:$4 sm:$0xff]   ;;  %v4176_v1 = vld [vmem:[%s5318_s5 + $0xb4] ss:$8 sps:$4 sm:$0xff]  }
 0x13a   : > { %1749 = vmatprep.subr.bf16.mxu0 %v4127_v5  ;;  %v3563_v20 = vld [vmem:[%s5318_s5 + $0x100] sm:$0x33]  ;;  %v3613_v3 = vld [vmem:[%s5318_s5 + $0x1b0] sm:$0x33] }
 0x13b   : > { %3473 = vmatprep.mubr.msk.bf16.mxu1 %vm1331_vm6, %v1267_v22  ;;  %3507 = vmatprep.mubr.msk.bf16.mxu0 %vm1331_vm6, %v1267_v22  ;;  %v3575_v21 = vcombine.high %v3563_v20, %v3563_v20  ;;  %v3625_v5 = vcombine.high %v3613_v3, %v3613_v3 }
 0x13c   : > { %1383 = vmatmul.mubr.bf16.gmra.mxu1 %v1266_v23  ;;  %1520 = vmatmul.mubr.bf16.gmra.mxu0 %v1266_v23 }
 0x13d   : > { %1773 = vmatprep.mubr.bf16.mxu0 %v4315_v2  ;;  %3823 = vmatprep.mubr.msk.bf16.mxu1 %vm4317_vm7, %v4316_v24 }
 0x13e   : > { %1750 = vmatpush1.bf16.msra.mxu0 %v4125_v6  ;;  %v3624_v6 = vcombine.low %v3613_v3, %v3613_v3 }
 0x13f   : > { %1751 = vmatprep.subr.bf16.mxu0 %v4133_v9  ;;  %v4181_v9 = vld [vmem:[%s5318_s5 + $0x1a4] ss:$8 sps:$4 sm:$0xff]  }
 0x142   : > { %1752 = vmatpush1.bf16.msra.mxu0 %v4131_v10  ;;  %v4179_v10 = vld [vmem:[%s5318_s5 + $0x1a0] ss:$8 sps:$4 sm:$0xff]  }
 0x143   : > { %1753 = vmatprep.subr.bf16.mxu0 %v4139_v13  ;;  %v4187_v13 = vld [vmem:[%s5318_s5 + $0x184] ss:$8 sps:$4 sm:$0xff]  }
 0x146   : > { %1754 = vmatpush1.bf16.msra.mxu0 %v4137_v14  ;;  %v4185_v14 = vld [vmem:[%s5318_s5 + $0x180] ss:$8 sps:$4 sm:$0xff]  }
 0x147   : > { %1755 = vmatprep.subr.bf16.mxu0 %v4144_v18  ;;  %v4193_v18 = vld [vmem:[%s5318_s5 + $0x164] ss:$8 sps:$4 sm:$0xff]  }
 0x14a   : > { %1756 = vmatpush1.bf16.msra.mxu0 %v4142_v19  ;;  %v4191_v19 = vld [vmem:[%s5318_s5 + $0x160] ss:$8 sps:$4 sm:$0xff]  }
 0x14b   : > { %3576 = vmatprep.subr.msk.bf16.mxu0 %vm1734_vm8, %v3575_v21  ;;  %v4194_v21 = vld [vmem:[%s5320_s7 + $0x38] sm:$0xff]  }
 0x1f4   : > { %v1376_v31 = vpop.f32.mrf.mxu1  ;;  %v1513_v32 = vpop.f32.mrf.mxu0 }
 0x1f5   : > { %v1528_v52 = vmax.f32 %v1376_v31, %v1513_v32  ;;  %v3599_v31 = vcombine.low %v3588_v15, %v3588_v15  ;;  %v4190_v15 = vld [vmem:[%s5318_s5 + $0x174] ss:$8 sps:$4 sm:$0xff]  }
 0x1f6   : > { %v1378_v33 = vpop.f32.mrf.mxu1  ;;  %v1515_v34 = vpop.f32.mrf.mxu0 }
 0x1f8   : > { %v1379_v35 = vpop.f32.mrf.mxu1  ;;  %v1516_v36 = vpop.f32.mrf.mxu0 }
 0x1f9   : > { %v1529_v50 = vmax.f32 %v1379_v35, %v1516_v36 }
 0x1fa   : > { %v1381_v37 = vpop.f32.mrf.mxu1  ;;  %v1518_v38 = vpop.f32.mrf.mxu0 }
 0x1fb   : > { %v1534_v53 = vpack.c.bf16 %v1529_v50, %v1528_v52  ;;  %v2089_v37 = vsel %vm1734_vm8, %v3599_v31, 0  ;;  %v4147_v38 = vld [vmem:[%s5318_s5 + $0x14c] ss:$8 sps:$4 sm:$0xff]   ;;  %v4153_v50 = vld [vmem:[%s5318_s5 + $0xf0] ss:$8 sps:$4 sm:$0xff]  }
 0x1fc   : > { %v1384_v39 = vpop.f32.mrf.mxu1  ;;  %v1521_v40 = vpop.f32.mrf.mxu0  ;;  %v4156_v52 = vld [vmem:[%s5318_s5 + $0x128] ss:$8 sps:$4 sm:$0xff]  }
 0x1fd   : > { %v1530_v45 = vmax.f32 %v1384_v39, %v1521_v40  ;;  %v3574_v40 = vcombine.low %v3563_v20, %v3563_v20  ;;  %v4201_v31 = vld [vmem:[%s5320_s7 + $0x70] sm:$0xff]  }
 0x1fe   : > { %v1386_v41 = vpop.f32.mrf.mxu1  ;;  %v1523_v42 = vpop.f32.mrf.mxu0 }
 0x1ff   : > { %v4145_v41 = vld [vmem:[%s5318_s5 + $0x148] ss:$8 sps:$4 sm:$0xff]  }
 0x200   : > { %v1387_v43 = vpop.f32.mrf.mxu1  ;;  %v1524_v44 = vpop.f32.mrf.mxu0 }
 0x201   : > { %v1531_v46 = vmax.f32 %v1387_v43, %v1524_v44  ;;  %v4152_v44 = vld [vmem:[%s5318_s5 + $0x13c] ss:$8 sps:$4 sm:$0xff]  }
 0x202   : > { %v1389_v47 = vpop.f32.mrf.mxu1  ;;  %v1526_v48 = vpop.f32.mrf.mxu0 }
 0x203   : > { %v1535_v49 = vpack.c.bf16 %v1531_v46, %v1530_v45  ;;  %v1963_v46 = vsel %vm1734_vm8, %v3574_v40, 0  ;;  %v4155_v47 = vld [vmem:[%s5318_s5 + $0xf4] ss:$8 sps:$4 sm:$0xff]   ;;  %v4150_v48 = vld [vmem:[%s5318_s5 + $0x138] ss:$8 sps:$4 sm:$0xff]   ;;  %v4210_v40 = vld [vmem:[%s5320_s7 + $0x48] sm:$0xff]  }
 0x205   : > { %v1547_v51 = vsel %vm1084_vm4, %v1535_v49, 0  ;;  %v4158_v49 = vld [vmem:[%s5318_s5 + $0x12c] ss:$8 sps:$4 sm:$0xff]  }
 0x206   : > { %3820 = vmatpush3.bf16.msra.mxu1 %v1547_v51 }
 0x207   : > { %3821 = vmatprep.subr.bf16.mxu1 %v4316_v24 }
 0x20a   : > { %3822 = vmatpush3.bf16.msra.mxu1 %v1534_v53 }
 0x20b   : > { %3827 = vmatprep.subr.bf16.mxu1 %v4316_v24 }
 0x20d   : > { %3824 = vmatmul.mubr.msk.bf16.vlgmr.msra.gmra.mxu1 %vm1541_vm9, %v4107_v54  ;;  %v4159_v54 = vld [vmem:[%s5318_s5 + $0xe0] ss:$8 sps:$4 sm:$0xff]  }
 0x20e   : > { %3828 = vmatpush3.bf16.msra.mxu1 %v1547_v51  ;;  %3831 = vmatprep.mubr.msk.bf16.mxu1 %vm4317_vm7, %v4316_v24  ;;  %v4161_v51 = vld [vmem:[%s5318_s5 + $0xe4] ss:$8 sps:$4 sm:$0xff]  }
 0x20f   : > { %3829 = vmatprep.subr.bf16.mxu1 %v4316_v24 }
 0x212   : > { %3830 = vmatpush3.bf16.msra.mxu1 %v1534_v53  ;;  %v4164_v53 = vld [vmem:[%s5318_s5 + $0x11c] ss:$8 sps:$4 sm:$0xff]  }
 0x213   : > { %3551 = vmatprep.subr.msk.bf16.mxu1 %vm1734_vm8, %v3550_v56  ;;  %v4162_v56 = vld [vmem:[%s5318_s5 + $0x118] ss:$8 sps:$4 sm:$0xff]  }
 0x215   : > { %3832 = vmatmul.mubr.msk.bf16.vlgmr.msra.gmra.mxu1 %vm1541_vm9, %v4108_v58  ;;  %v4165_v58 = vld [vmem:[%s5318_s5 + $0xd0] ss:$8 sps:$4 sm:$0xff]  }
 0x216   : > { %1852 = vmatpush1.bf16.msra.mxu1 %v1842_v59  ;;  %1879 = vmatprep.mubr.bf16.mxu1 %v4315_v2  ;;  %v4173_v59 = vld [vmem:[%s5318_s5 + $0xc4] ss:$8 sps:$4 sm:$0xff]  }
 0x217   : > { %1853 = vmatprep.subr.bf16.mxu1 %v4113_v60  ;;  %v4168_v60 = vld [vmem:[%s5318_s5 + $0x108] ss:$8 sps:$4 sm:$0xff]  }
 0x21a   : > { %1854 = vmatpush1.bf16.msra.mxu1 %v4111_v62 }
 0x21b   : > { %1855 = vmatprep.subr.bf16.mxu1 %v4118_v61 }
 0x21e   : > { %1856 = vmatpush1.bf16.msra.mxu1 %v4116_v0  ;;  %v4171_v0 = vld [vmem:[%s5318_s5 + $0xc0] ss:$8 sps:$4 sm:$0xff]  }
 0x21f   : > { %1857 = vmatprep.subr.bf16.mxu1 %v4124_v63 }
 0x222   : > { %1858 = vmatpush1.bf16.msra.mxu1 %v4122_v4  ;;  %v4174_v4 = vld [vmem:[%s5318_s5 + $0xb0] ss:$8 sps:$4 sm:$0xff]  }
 0x223   : > { %1859 = vmatprep.subr.bf16.mxu1 %v4130_v7 }
 0x226   : > { %1860 = vmatpush1.bf16.msra.mxu1 %v4128_v8  ;;  %v2213_v8 = vsel %vm1734_vm8, %v3624_v6, 0 }
 0x227   : > { %1861 = vmatprep.subr.bf16.mxu1 %v4136_v11  ;;  %v4184_v11 = vld [vmem:[%s5318_s5 + $0x194] ss:$8 sps:$4 sm:$0xff]  }
 0x22a   : > { %1862 = vmatpush1.bf16.msra.mxu1 %v4134_v12  ;;  %v4182_v12 = vld [vmem:[%s5318_s5 + $0x190] ss:$8 sps:$4 sm:$0xff]  }
 0x22b   : > { %3601 = vmatprep.subr.msk.bf16.mxu1 %vm1734_vm8, %v3600_v16  ;;  %v4188_v16 = vld [vmem:[%s5318_s5 + $0x170] ss:$8 sps:$4 sm:$0xff]  }
 0x2cd   : > { %v1583_v22 = vpop.f32.mrf.mxu1 }
 0x2cf   : > { %v3825_v23 = vpop.f32.mrf.mxu1 }
 0x2d0   : > { %v4196_v23 = vld [vmem:[%s5320_s7 + $0x30] sm:$0xff]  }
 0x2d1   : > { %v1586_v26 = vpop.f32.mrf.mxu1 }
 0x2d3   : > { %v3826_v28 = vpop.f32.mrf.mxu1 }
 0x2d4   : > { %v4198_v28 = vld [vmem:[%s5320_s7 + $0x28] sm:$0xff]  }
 0x2d5   : > { %v1635_v29 = vpop.f32.mrf.mxu1 }
 0x2d6   : > { %v1642_v33 = vmax.f32 %v1583_v22, %v1635_v29  ;;  %v4195_v22 = vld [vmem:[%s5320_s7 + $0x88] sm:$0xff]   ;;  %v4199_v29 = vld [vmem:[%s5320_s7 + $0x78] sm:$0xff]  }
 0x2d7   : > { %v3833_v30 = vpop.f32.mrf.mxu1 }
 0x2d8   : > { %v4200_v30 = vld [vmem:[%s5320_s7 + $0x20] sm:$0xff]  }
 0x2d9   : > { %v1638_v32 = vpop.f32.mrf.mxu1 }
 0x2da   : > { %v1643_v34 = vmax.f32 %v1586_v26, %v1638_v32  ;;  %v4197_v26 = vld [vmem:[%s5320_s7 + $0x80] sm:$0xff]   ;;  %v4202_v32 = vld [vmem:[%s5320_s7 + $0x18] sm:$0xff]  }
 0x2db   : > { %v3834_v35 = vpop.f32.mrf.mxu1 }
 0x2dc   : > { %v4869_v36 = vpack.c.bf16 %v1643_v34, %v1642_v33  ;;  %v4203_v33 = vld [vmem:[%s5320_s7 + $0x68] sm:$0xff]   ;;  %v4204_v34 = vld [vmem:[%s5320_s7 + $0x10] sm:$0xff]   ;;  %v4205_v35 = vld [vmem:[%s5320_s7 + $0x60] sm:$0xff]  }
 0x2de   : > { %v1671_v39 = vshll.u32 %v4869_v36, 16  ;;  %3552 = vmatmul.mubr.msk.bf16.vlgmr.msra.gmra.mxu1 %vm1730_vm10, %v4869_v36  ;;  %v1669_v42 = vshrl.u32 %v4869_v36, 16  ;;  %v1903_v7 = vrot.slane %v4869_v36, 1  ;;  %v2153_v20 = vrot.slane %v4869_v36, 2  ;;  %v4206_v36 = vld [vmem:[%s5320_s7 + $0x8] sm:$0xff]  }
 0x2df   : > { %2099 = vmatpush1.bf16.msra.mxu1 %v2089_v37  ;;  %2126 = vmatprep.mubr.bf16.mxu1 %v4315_v2  ;;  %v4207_v37 = vld [vmem:[%s5320_s7 + $0x58] sm:$0xff]  }
 0x2e0   : > { %v1673_v43 = vrot.slane %v1671_v39, 1  ;;  %2100 = vmatprep.subr.bf16.mxu1 %v4147_v38  ;;  %v2027_v62 = vrot.slane %v1669_v42, 1  ;;  %v2028_v61 = vrot.slane %v1671_v39, 2  ;;  %v4208_v38 = vld [vmem:[%s5320_s7] sm:$0xff]   ;;  %v4209_v39 = vld [vmem:[%s5320_s7 + $0x50] sm:$0xff]  }
 0x2e2   : > { %v1674_v45 = vor.u32 %v1673_v43, %v1669_v42  ;;  %v2029_v63 = vor.u32 %v2028_v61, %v2027_v62  ;;  %v4212_v42 = vld [vmem:[%s5320_s7 + $0x40] sm:$0xff]   ;;  %v4213_v43 = vld [vmem:[%s5320_s7 + $0x90] sm:$0xff]  }
 0x2e3   : > { %2101 = vmatpush1.bf16.msra.mxu1 %v4145_v41  ;;  %v4211_v41 = vld [vmem:[%s5320_s7 + $0x98] sm:$0xff]  }
 0x2e4   : > { %3538 = vmatmul.mubr.msk.bf16.vlgmr.msra.gmra.mxu0 %vm1730_vm10, %v1674_v45  ;;  %2102 = vmatprep.subr.bf16.mxu1 %v4152_v44 }
 0x2e5   : > { %1973 = vmatpush1.bf16.msra.mxu0 %v1963_v46  ;;  %2000 = vmatprep.mubr.bf16.mxu0 %v4315_v2 }
 0x2e6   : > { %1974 = vmatprep.subr.bf16.mxu0 %v4155_v47 }
 0x2e7   : > { %2103 = vmatpush1.bf16.msra.mxu1 %v4150_v48 }
 0x2e8   : > { %2104 = vmatprep.subr.bf16.mxu1 %v4158_v49 }
 0x2e9   : > { %1975 = vmatpush1.bf16.msra.mxu0 %v4153_v50 }
 0x2ea   : > { %1976 = vmatprep.subr.bf16.mxu0 %v4161_v51 }
 0x2eb   : > { %2105 = vmatpush1.bf16.msra.mxu1 %v4156_v52 }
 0x2ec   : > { %2106 = vmatprep.subr.bf16.mxu1 %v4164_v53 }
 0x2ed   : > { %1977 = vmatpush1.bf16.msra.mxu0 %v4159_v54 }
 0x2ee   : > { %1978 = vmatprep.subr.bf16.mxu0 %v4167_v55 }
 0x2ef   : > { %2107 = vmatpush1.bf16.msra.mxu1 %v4162_v56 }
 0x2f0   : > { %2108 = vmatprep.subr.bf16.mxu1 %v4170_v57 }
 0x2f1   : > { %1979 = vmatpush1.bf16.msra.mxu0 %v4165_v58 }
 0x2f2   : > { %1980 = vmatprep.subr.bf16.mxu0 %v4173_v59 }
 0x2f3   : > { %2109 = vmatpush1.bf16.msra.mxu1 %v4168_v60 }
 0x2f4   : > { %2371 = vmatprep.subr.bf16.mxu1 %v4315_v2 }
 0x2f5   : > { %1981 = vmatpush1.bf16.msra.mxu0 %v4171_v0 }
 0x2f6   : > { %3602 = vmatmul.mubr.msk.bf16.vlgmr.msra.gmra.mxu1 %vm1730_vm10, %v2029_v63  ;;  %1982 = vmatprep.subr.bf16.mxu0 %v4176_v1 }
 0x2f7   : > { %2372 = vmatpush1.bf16.msra.mxu1 %v4194_v21 }
 0x2f8   : > { %2373 = vmatprep.subr.bf16.mxu1 %v4315_v2 }
 0x2f9   : > { %1983 = vmatpush1.bf16.msra.mxu0 %v4174_v4  ;;  %v2265_v4 = vld [vmem:[%s5319_s6] sm:$0x3] }
 0x2fa   : > { %3626 = vmatprep.subr.msk.bf16.mxu0 %vm1734_vm8, %v3625_v5 }
 0x2fb   : > { %2374 = vmatpush1.bf16.msra.mxu1 %v4196_v23 }
 0x2fc   : > { %3577 = vmatmul.mubr.msk.bf16.vlgmr.msra.gmra.mxu0 %vm1730_vm10, %v1903_v7  ;;  %2375 = vmatprep.subr.bf16.mxu1 %v4315_v2 }
 0x2fd   : > { %2223 = vmatpush1.bf16.msra.mxu0 %v2213_v8  ;;  %2250 = vmatprep.mubr.bf16.mxu0 %v4315_v2 }
 0x2fe   : > { %2224 = vmatprep.subr.bf16.mxu0 %v4181_v9  ;;  %v2274_v9 = vrot.slane %v2265_v4, %v1223_v25 }
 0x2ff   : > { %2376 = vmatpush1.bf16.msra.mxu1 %v4198_v28 }
 0x300   : > { %2377 = vmatprep.subr.bf16.mxu1 %v4315_v2 }
 0x301   : > { %2225 = vmatpush1.bf16.msra.mxu0 %v4179_v10 }
 0x302   : > { %2226 = vmatprep.subr.bf16.mxu0 %v4184_v11 }
 0x303   : > { %2378 = vmatpush1.bf16.msra.mxu1 %v4200_v30 }
 0x304   : > { %2379 = vmatprep.subr.bf16.mxu1 %v4315_v2 }
 0x305   : > { %2227 = vmatpush1.bf16.msra.mxu0 %v4182_v12 }
 0x306   : > { %2228 = vmatprep.subr.bf16.mxu0 %v4187_v13  ;;  %v2270_v13 = vrot.slane %v2265_v4, %v1219_v27  ;;  %v4216_v27 = vld [vmem:[%s5322_s9 + $0x18] sm:$0xff]   ;;  %v4227_v4 = vld [vmem:[%s5322_s9 + $0x68] sm:$0xff]  }
 0x307   : > { %2380 = vmatpush1.bf16.msra.mxu1 %v4202_v32 }
 0x308   : > { %2381 = vmatprep.subr.bf16.mxu1 %v4315_v2 }
 0x309   : > { %2229 = vmatpush1.bf16.msra.mxu0 %v4185_v14 }
 0x30a   : > { %2230 = vmatprep.subr.bf16.mxu0 %v4190_v15 }
 0x30b   : > { %2382 = vmatpush1.bf16.msra.mxu1 %v4204_v34 }
 0x30c   : > { %2383 = vmatprep.subr.bf16.mxu1 %v4315_v2 }
 0x30d   : > { %2231 = vmatpush1.bf16.msra.mxu0 %v4188_v16 }
 0x30e   : > { %2232 = vmatprep.subr.bf16.mxu0 %v4193_v18 }
 0x30f   : > { %2384 = vmatpush1.bf16.msra.mxu1 %v4206_v36 }
 0x310   : > { %2385 = vmatprep.subr.bf16.mxu1 %v4315_v2 }
 0x311   : > { %2233 = vmatpush1.bf16.msra.mxu0 %v4191_v19 }
 0x312   : > { %2493 = vmatprep.subr.bf16.mxu0 %v4315_v2 }
 0x313   : > { %2386 = vmatpush1.bf16.msra.mxu1 %v4208_v38 }
 0x314   : > { %3627 = vmatmul.mubr.msk.bf16.vlgmr.msra.gmra.mxu0 %vm1730_vm10, %v2153_v20  ;;  %2399 = vmatprep.subr.bf16.mxu1 %v4315_v2 }
 0x315   : > { %2494 = vmatpush1.bf16.msra.mxu0 %v4195_v22 }
 0x316   : > { %2495 = vmatprep.subr.bf16.mxu0 %v4315_v2 }
 0x317   : > { %2400 = vmatpush2.bf16.msra.mxu1 %v4210_v40 }
 0x318   : > { %2401 = vmatprep.subr.bf16.mxu1 %v4315_v2 }
 0x319   : > { %2496 = vmatpush1.bf16.msra.mxu0 %v4197_v26 }
 0x31a   : > { %2497 = vmatprep.subr.bf16.mxu0 %v4315_v2 }
 0x31b   : > { %2402 = vmatpush2.bf16.msra.mxu1 %v4212_v42 }
 0x31c   : > { %3835 = vmatprep.subr.bf16.mxu1 %v4316_v24 }
 0x31d   : > { %2498 = vmatpush1.bf16.msra.mxu0 %v4199_v29 }
 0x31e   : > { %2499 = vmatprep.subr.bf16.mxu0 %v4315_v2 }
 0x321   : > { %2500 = vmatpush1.bf16.msra.mxu0 %v4201_v31 }
 0x322   : > { %2501 = vmatprep.subr.bf16.mxu0 %v4315_v2 }
 0x325   : > { %2502 = vmatpush1.bf16.msra.mxu0 %v4203_v33 }
 0x326   : > { %2503 = vmatprep.subr.bf16.mxu0 %v4315_v2 }
 0x329   : > { %2504 = vmatpush1.bf16.msra.mxu0 %v4205_v35 }
 0x32a   : > { %2505 = vmatprep.subr.bf16.mxu0 %v4315_v2 }
 0x32d   : > { %2506 = vmatpush1.bf16.msra.mxu0 %v4207_v37 }
 0x32e   : > { %2507 = vmatprep.subr.bf16.mxu0 %v4315_v2 }
 0x331   : > { %2508 = vmatpush1.bf16.msra.mxu0 %v4209_v39 }
 0x332   : > { %2521 = vmatprep.subr.bf16.mxu0 %v4315_v2 }
 0x335   : > { %2522 = vmatpush2.bf16.msra.mxu0 %v4211_v41 }
 0x336   : > { %2523 = vmatprep.subr.bf16.mxu0 %v4315_v2 }
 0x339   : > { %2524 = vmatpush2.bf16.msra.mxu0 %v4213_v43 }
 0x33a   : > { %3861 = vmatprep.subr.bf16.mxu0 %v4316_v24 }
 0x39e   : > { %v1881_v46 = vpop.f32.mrf.mxu1 }
 0x3a0   : > { %v1883_v48 = vpop.f32.mrf.mxu1 }
 0x3a2   : > { %v1885_v49 = vpop.f32.mrf.mxu1 }
 0x3a4   : > { %v1775_v44 = vpop.f32.mrf.mxu0  ;;  %v1887_v51 = vpop.f32.mrf.mxu1 }
 0x3a5   : > { %v1882_v56 = vadd.f32 %v1881_v46, %v1775_v44  ;;  %v2536_v44 = vld [vmem:[%s5321_s8] sm:$0x7]  ;;  %v4215_v46 = vld [vmem:[%s5322_s9 + $0x48] sm:$0xff]  }
 0x3a6   : > { %v1777_v45 = vpop.f32.mrf.mxu0 }
 0x3a7   : > { %v1884_v55 = vadd.f32 %v1883_v48, %v1777_v45  ;;  %v3671_v45 = vld [vmem:[%s5321_s8 + $0x4] sm:$0x7]  ;;  %v4218_v48 = vld [vmem:[%s5322_s9 + $0x10] sm:$0xff]  }
 0x3a8   : > { %v1779_v47 = vpop.f32.mrf.mxu0 }
 0x3a9   : > { %v1886_v58 = vadd.f32 %v1885_v49, %v1779_v47  ;;  %v4217_v47 = vld [vmem:[%s5322_s9 + $0x40] sm:$0xff]   ;;  %v4220_v49 = vld [vmem:[%s5322_s9 + $0x8] sm:$0xff]  }
 0x3aa   : > { %v1781_v2 = vpop.f32.mrf.mxu0 }
 0x3ab   : > { %v1888_v61 = vadd.f32 %v1887_v51, %v1781_v2  ;;  %v4219_v2 = vld [vmem:[%s5322_s9 + $0x38] sm:$0xff]   ;;  %v4222_v51 = vld [vmem:[%s5322_s9] sm:$0xff]  }
 0x3b6   : > { %v2128_v53 = vpop.f32.mrf.mxu1 }
 0x3b8   : > { %v2130_v57 = vpop.f32.mrf.mxu1 }
 0x3ba   : > { %v2132_v1 = vpop.f32.mrf.mxu1 }
 0x3bc   : > { %v2002_v50 = vpop.f32.mrf.mxu0  ;;  %v2134_v11 = vpop.f32.mrf.mxu1 }
 0x3bd   : > { %v2011_v60 = vadd.f32 %v2002_v50, %v1882_v56  ;;  %v4221_v50 = vld [vmem:[%s5322_s9 + $0x30] sm:$0xff]  }
 0x3be   : > { %v2004_v52 = vpop.f32.mrf.mxu0 }
 0x3bf   : > { %v2012_v59 = vadd.f32 %v2004_v52, %v1884_v55  ;;  %v2137_v6 = vadd.f32 %v2128_v53, %v2011_v60  ;;  %v4223_v52 = vld [vmem:[%s5322_s9 + $0x28] sm:$0xff]   ;;  %v4224_v60 = vld [vmem:[%s5322_s9 + $0x98] sm:$0xff]  }
 0x3c0   : > { %v2006_v54 = vpop.f32.mrf.mxu0 }
 0x3c1   : > { %v2013_v0 = vadd.f32 %v2006_v54, %v1886_v58  ;;  %v2138_v5 = vadd.f32 %v2130_v57, %v2012_v59 }
 0x3c2   : > { %v2008_v62 = vpop.f32.mrf.mxu0 }
 0x3c3   : > { %v2014_v63 = vadd.f32 %v2008_v62, %v1888_v61  ;;  %v2139_v10 = vadd.f32 %v2132_v1, %v2013_v0  ;;  %v4225_v0 = vld [vmem:[%s5322_s9 + $0x70] sm:$0xff]  }
 0x3c5   : > { %v2140_v16 = vadd.f32 %v2134_v11, %v2014_v63  ;;  %v4226_v63 = vld [vmem:[%s5322_s9 + $0x90] sm:$0xff]  }
 0x3d4   : > { %v2252_v3 = vpop.f32.mrf.mxu0 }
 0x3d5   : > { %v2261_v12 = vadd.f32 %v2252_v3, %v2137_v6  ;;  %v4229_v6 = vld [vmem:[%s5322_s9 + $0x60] sm:$0xff]  }
 0x3d6   : > { %v2254_v7 = vpop.f32.mrf.mxu0 }
 0x3d7   : > { %v2262_v8 = vadd.f32 %v2254_v7, %v2138_v5  ;;  %v2277_v22 = vadd.f32 %v2270_v13, %v2261_v12  ;;  %v4228_v5 = vld [vmem:[%s5322_s9 + $0x88] sm:$0xff]   ;;  %v4230_v7 = vld [vmem:[%s5322_s9 + $0x80] sm:$0xff]  }
 0x3d8   : > { %v2256_v14 = vpop.f32.mrf.mxu0  ;;  %v4234_v12 = vld [vmem:[%s5322_s9 + $0xc0] sm:$0xff]  }
 0x3d9   : > { %v2263_v15 = vadd.f32 %v2256_v14, %v2139_v10  ;;  %v2278_v19 = vadd.f32 %v2274_v9, %v2262_v8  ;;  %v2281_v30 = vmax.f32 %v2277_v22, 0.0  ;;  %v4231_v8 = vld [vmem:[%s5322_s9 + $0x58] sm:$0xff]   ;;  %v4233_v10 = vld [vmem:[%s5322_s9 + $0x50] sm:$0xff]  }
 0x3da   : > { %v2258_v18 = vpop.f32.mrf.mxu0  ;;  %v4235_v14 = vld [vmem:[%s5322_s9 + $0xb8] sm:$0xff]   ;;  %v4240_v22 = vld [vmem:[%s5324_s11 + $0x30] sm:$0xff]  }
 0x3db   : > { %v2279_v20 = vadd.f32 %v2270_v13, %v2263_v15  ;;  %v2264_v21 = vadd.f32 %v2258_v18, %v2140_v16  ;;  %v2282_v28 = vmax.f32 %v2278_v19, 0.0  ;;  %v4236_v15 = vld [vmem:[%s5322_s9 + $0xb0] sm:$0xff]   ;;  %v4237_v16 = vld [vmem:[%s5322_s9 + $0xa8] sm:$0xff]   ;;  %v4238_v18 = vld [vmem:[%s5322_s9 + $0xa0] sm:$0xff]  }
 0x3dd   : > { %v2280_v23 = vadd.f32 %v2274_v9, %v2264_v21  ;;  %v2283_v26 = vmax.f32 %v2279_v20, 0.0  ;;  %v4232_v9 = vld [vmem:[%s5322_s9 + $0x78] sm:$0xff]  }
 0x3de   : > { %v4239_v20 = vld [vmem:[%s5324_s11 + $0x38] ss:$0 sps:$4 sm:$0xff]  }
 0x3df   : > { %v2284_v29 = vmax.f32 %v2280_v23, 0.0  ;;  %v2305_v31 = vpack.c.bf16 %v2283_v26, %v2281_v30  ;;  %v3132_v21 = vsel %vm1338_vm5, %v4239_v20, 0  ;;  %v4241_v23 = vld [vmem:[%s5324_s11 + $0x28] sm:$0xff]   ;;  %v4242_v26 = vld [vmem:[%s5324_s11 + $0x20] sm:$0xff]  }
 0x3e0   : > { %v4245_v30 = vld [vmem:[%s5324_s11 + $0x8] sm:$0xff]  }
 0x3e1   : > { %v2306_v25 = vpack.c.bf16 %v2284_v29, %v2282_v28  ;;  %v4243_v28 = vld [vmem:[%s5324_s11 + $0x18] sm:$0xff]   ;;  %v4244_v29 = vld [vmem:[%s5324_s11 + $0x10] sm:$0xff]  }
 0x3e3   : > { %3638 = vmatprep.mubr.msk.bf16.mxu1 %vm2367_vm11, %v2306_v25  ;;  %3669 = vmatprep.mubr.msk.bf16.mxu0 %vm2367_vm11, %v2306_v25  ;;  %v4246_v25 = vld [vmem:[%s5324_s11] sm:$0xff]  }
 0x3e4   : > { %2404 = vmatmul.mubr.bf16.vlgmr.msra.gmra.mxu1 %v2305_v31  ;;  %2526 = vmatmul.mubr.bf16.vlgmr.msra.gmra.mxu0 %v2305_v31  ;;  %v4247_v31 = vld [vmem:[%s5326_s13 + $0x28] ss:$0 sps:$4 sm:$0x33]  }
 0x3e5   : > { %3837 = vmatprep.mubr.msk.bf16.mxu1 %vm4317_vm7, %v4316_v24  ;;  %3871 = vmatprep.mubr.msk.bf16.mxu0 %vm4317_vm7, %v4316_v24 }
 0x3e6   : > { %3862 = vmatpush3.bf16.msra.mxu0 %v4214_v17  ;;  %v3225_v17 = vsel %vm1734_vm8, %v4247_v31, 0 }
 0x3e7   : > { %3863 = vmatprep.subr.bf16.mxu0 %v4316_v24 }
 0x3ea   : > { %3864 = vmatpush3.bf16.msra.mxu0 %v4216_v27  ;;  %v4248_v27 = vld [vmem:[%s5326_s13 + $0x20] sm:$0xff]  }
 0x3eb   : > { %3865 = vmatprep.subr.bf16.mxu0 %v4316_v24 }
 0x3ee   : > { %3866 = vmatpush3.bf16.msra.mxu0 %v4218_v48 }
 0x3ef   : > { %3867 = vmatprep.subr.bf16.mxu0 %v4316_v24 }
 0x3f2   : > { %3868 = vmatpush3.bf16.msra.mxu0 %v4220_v49 }
 0x3f3   : > { %3869 = vmatprep.subr.bf16.mxu0 %v4316_v24 }
 0x3f6   : > { %3870 = vmatpush3.bf16.msra.mxu0 %v4222_v51 }
 0x3f7   : > { %3889 = vmatprep.subr.bf16.mxu0 %v4316_v24 }
 0x4a4   : > { %v2405_v32 = vpop.f32.mrf.mxu1  ;;  %v2527_v33 = vpop.f32.mrf.mxu0 }
 0x4a5   : > { %v2534_v38 = vmax.f32 %v2405_v32, %v2527_v33  ;;  %v4249_v32 = vld [vmem:[%s5326_s13 + $0x18] sm:$0xff]   ;;  %v4250_v33 = vld [vmem:[%s5326_s13 + $0x10] sm:$0xff]  }
 0x4a6   : > { %v2407_v34 = vpop.f32.mrf.mxu1  ;;  %v2529_v35 = vpop.f32.mrf.mxu0 }
 0x4a8   : > { %v2408_v36 = vpop.f32.mrf.mxu1  ;;  %v2530_v37 = vpop.f32.mrf.mxu0 }
 0x4a9   : > { %v2535_v39 = vmax.f32 %v2408_v36, %v2530_v37 }
 0x4aa   : > { %v2410_v40 = vpop.f32.mrf.mxu1  ;;  %v2532_v41 = vpop.f32.mrf.mxu0 }
 0x4ab   : > { %v2537_v42 = vpack.c.bf16 %v2535_v39, %v2534_v38 }
 0x4ad   : > { %v2544_v43 = vsel %vm2542_vm12, %v2537_v42, 0 }
 0x4ae   : > { %3836 = vmatpush3.bf16.msra.mxu1 %v2544_v43 }
 0x4af   : > { %3841 = vmatprep.subr.bf16.mxu1 %v4316_v24 }
 0x4b1   : > { %3838 = vmatmul.mubr.msk.bf16.vlgmr.msra.gmra.mxu1 %vm2538_vm13, %v2536_v44 }
 0x4b2   : > { %3842 = vmatpush3.bf16.msra.mxu1 %v2544_v43  ;;  %3843 = vmatprep.mubr.msk.bf16.mxu1 %vm4317_vm7, %v4316_v24 }
 0x4b3   : > { %3847 = vmatprep.subr.bf16.mxu1 %v4316_v24 }
 0x4b9   : > { %3844 = vmatmul.mubr.msk.bf16.vlgmr.msra.gmra.mxu1 %vm2538_vm13, %v3671_v45 }
 0x4ba   : > { %3848 = vmatpush3.bf16.msra.mxu1 %v4215_v46  ;;  %3857 = vmatprep.mubr.msk.bf16.mxu1 %vm4317_vm7, %v4316_v24 }
 0x4bb   : > { %3849 = vmatprep.subr.bf16.mxu1 %v4316_v24 }
 0x4be   : > { %3850 = vmatpush3.bf16.msra.mxu1 %v4217_v47 }
 0x4bf   : > { %3851 = vmatprep.subr.bf16.mxu1 %v4316_v24 }
 0x4c2   : > { %3852 = vmatpush3.bf16.msra.mxu1 %v4219_v2 }
 0x4c3   : > { %3853 = vmatprep.subr.bf16.mxu1 %v4316_v24 }
 0x4c6   : > { %3854 = vmatpush3.bf16.msra.mxu1 %v4221_v50 }
 0x4c7   : > { %3855 = vmatprep.subr.bf16.mxu1 %v4316_v24 }
 0x4ca   : > { %3856 = vmatpush3.bf16.msra.mxu1 %v4223_v52 }
 0x4cb   : > { %3875 = vmatprep.subr.bf16.mxu1 %v4316_v24 }
 0x571   : > { %v2580_v53 = vpop.f32.mrf.mxu1 }
 0x573   : > { %v3839_v54 = vpop.f32.mrf.mxu1 }
 0x575   : > { %v2583_v55 = vpop.f32.mrf.mxu1 }
 0x577   : > { %v3840_v56 = vpop.f32.mrf.mxu1 }
 0x579   : > { %v2625_v57 = vpop.f32.mrf.mxu1 }
 0x57a   : > { %v2631_v58 = vmax.f32 %v2580_v53, %v2625_v57  ;;  %v3062_v53 = vld [vmem:[%s5323_s10] sm:$0x1] }
 0x57b   : > { %v3845_v59 = vpop.f32.mrf.mxu1 }
 0x57c   : > { %v2642_v62 = vpack.c.bf16 %v2631_v58, %v2631_v58 }
 0x57d   : > { %v2628_v61 = vpop.f32.mrf.mxu1 }
 0x57e   : > { %v2655_v1 = vshrl.u32 %v2642_v62, 16  ;;  %3872 = vmatmul.mubr.msk.bf16.vlgmr.msra.gmra.mxu0 %vm2687_vm14, %v2642_v62  ;;  %v2815_v13 = vrot.slane %v2642_v62, 1  ;;  %v2987_v19 = vrot.slane %v2642_v62, 2  ;;  %v4251_v62 = vld [vmem:[%s5326_s13 + $0x8] sm:$0xff]   ;;  %v4252_v61 = vld [vmem:[%s5326_s13] sm:$0xff]  }
 0x57f   : > { %3890 = vmatpush3.bf16.msra.mxu0 %v4224_v60  ;;  %v3846_v3 = vpop.f32.mrf.mxu1  ;;  %3899 = vmatprep.mubr.msk.bf16.mxu0 %vm4317_vm7, %v4316_v24 }
 0x580   : > { %3858 = vmatmul.mubr.msk.bf16.vlgmr.msra.gmra.mxu1 %vm2687_vm14, %v2655_v1  ;;  %3891 = vmatprep.subr.bf16.mxu0 %v4316_v24  ;;  %v2901_v11 = vrot.slane %v2655_v1, 1 }
 0x581   : > { %3876 = vmatpush3.bf16.msra.mxu1 %v4225_v0  ;;  %3885 = vmatprep.mubr.msk.bf16.mxu1 %vm4317_vm7, %v4316_v24  ;;  %v3081_v0 = vld [vmem:[%s5325_s12] sm:$0x1] }
 0x582   : > { %3877 = vmatprep.subr.bf16.mxu1 %v4316_v24 }
 0x583   : > { %3892 = vmatpush3.bf16.msra.mxu0 %v4226_v63 }
 0x584   : > { %3893 = vmatprep.subr.bf16.mxu0 %v4316_v24 }
 0x585   : > { %3878 = vmatpush3.bf16.msra.mxu1 %v4227_v4 }
 0x586   : > { %3879 = vmatprep.subr.bf16.mxu1 %v4316_v24 }
 0x587   : > { %3894 = vmatpush3.bf16.msra.mxu0 %v4228_v5 }
 0x588   : > { %3895 = vmatprep.subr.bf16.mxu0 %v4316_v24 }
 0x589   : > { %3880 = vmatpush3.bf16.msra.mxu1 %v4229_v6 }
 0x58a   : > { %3881 = vmatprep.subr.bf16.mxu1 %v4316_v24 }
 0x58b   : > { %3896 = vmatpush3.bf16.msra.mxu0 %v4230_v7 }
 0x58c   : > { %3897 = vmatprep.subr.bf16.mxu0 %v4316_v24 }
 0x58d   : > { %3882 = vmatpush3.bf16.msra.mxu1 %v4231_v8 }
 0x58e   : > { %3883 = vmatprep.subr.bf16.mxu1 %v4316_v24 }
 0x58f   : > { %3898 = vmatpush3.bf16.msra.mxu0 %v4232_v9 }
 0x590   : > { %3917 = vmatprep.subr.bf16.mxu0 %v4316_v24 }
 0x591   : > { %3884 = vmatpush3.bf16.msra.mxu1 %v4233_v10 }
 0x592   : > { %3900 = vmatmul.mubr.msk.bf16.vlgmr.msra.gmra.mxu0 %vm2687_vm14, %v2901_v11  ;;  %3903 = vmatprep.subr.bf16.mxu1 %v4316_v24 }
 0x593   : > { %3933 = vmatprep.mubr.msk.bf16.mxu0 %vm4317_vm7, %v4316_v24  ;;  %3918 = vmatpush3.bf16.msra.mxu0 %v3132_v21 }
 0x594   : > { %3886 = vmatmul.mubr.msk.bf16.vlgmr.msra.gmra.mxu1 %vm2687_vm14, %v2815_v13  ;;  %3919 = vmatprep.subr.bf16.mxu0 %v4316_v24 }
 0x595   : > { %3904 = vmatpush3.bf16.msra.mxu1 %v4234_v12  ;;  %3913 = vmatprep.mubr.msk.bf16.mxu1 %vm4317_vm7, %v4316_v24 }
 0x596   : > { %3905 = vmatprep.subr.bf16.mxu1 %v4316_v24 }
 0x597   : > { %3920 = vmatpush3.bf16.msra.mxu0 %v4240_v22 }
 0x598   : > { %3921 = vmatprep.subr.bf16.mxu0 %v4316_v24 }
 0x599   : > { %3906 = vmatpush3.bf16.msra.mxu1 %v4235_v14 }
 0x59a   : > { %3907 = vmatprep.subr.bf16.mxu1 %v4316_v24 }
 0x59b   : > { %3922 = vmatpush3.bf16.msra.mxu0 %v4241_v23 }
 0x59c   : > { %3923 = vmatprep.subr.bf16.mxu0 %v4316_v24 }
 0x59d   : > { %3908 = vmatpush3.bf16.msra.mxu1 %v4236_v15 }
 0x59e   : > { %3909 = vmatprep.subr.bf16.mxu1 %v4316_v24 }
 0x59f   : > { %3924 = vmatpush3.bf16.msra.mxu0 %v4242_v26 }
 0x5a0   : > { %3925 = vmatprep.subr.bf16.mxu0 %v4316_v24 }
 0x5a1   : > { %3910 = vmatpush3.bf16.msra.mxu1 %v4237_v16 }
 0x5a2   : > { %3911 = vmatprep.subr.bf16.mxu1 %v4316_v24 }
 0x5a3   : > { %3926 = vmatpush3.bf16.msra.mxu0 %v4243_v28 }
 0x5a4   : > { %3927 = vmatprep.subr.bf16.mxu0 %v4316_v24 }
 0x5a5   : > { %3912 = vmatpush3.bf16.msra.mxu1 %v4238_v18 }
 0x5a6   : > { %3937 = vmatprep.subr.bf16.mxu1 %v4316_v24 }
 0x5a7   : > { %3928 = vmatpush3.bf16.msra.mxu0 %v4244_v29 }
 0x5a8   : > { %3914 = vmatmul.mubr.msk.bf16.vlgmr.msra.gmra.mxu1 %vm2687_vm14, %v2987_v19  ;;  %3929 = vmatprep.subr.bf16.mxu0 %v4316_v24 }
 0x5a9   : > { %3949 = vmatprep.mubr.msk.bf16.mxu1 %vm4317_vm7, %v4316_v24  ;;  %3938 = vmatpush3.bf16.msra.mxu1 %v3225_v17 }
 0x5aa   : > { %3939 = vmatprep.subr.bf16.mxu1 %v4316_v24 }
 0x5ab   : > { %3930 = vmatpush3.bf16.msra.mxu0 %v4245_v30 }
 0x5ac   : > { %3931 = vmatprep.subr.bf16.mxu0 %v4316_v24 }
 0x5ad   : > { %3940 = vmatpush3.bf16.msra.mxu1 %v4248_v27 }
 0x5ae   : > { %3941 = vmatprep.subr.bf16.mxu1 %v4316_v24 }
 0x5af   : > { %3932 = vmatpush3.bf16.msra.mxu0 %v4246_v25 }
 0x5b1   : > { %3942 = vmatpush3.bf16.msra.mxu1 %v4249_v32 }
 0x5b2   : > { %3943 = vmatprep.subr.bf16.mxu1 %v4316_v24 }
 0x5b5   : > { %3944 = vmatpush3.bf16.msra.mxu1 %v4250_v33 }
 0x5b6   : > { %3945 = vmatprep.subr.bf16.mxu1 %v4316_v24 }
 0x5b9   : > { %3946 = vmatpush3.bf16.msra.mxu1 %v4251_v62 }
 0x5ba   : > { %3947 = vmatprep.subr.bf16.mxu1 %v4316_v24  ;;  %v3187_v24 = vld [vmem:[%s5327_s14] sm:$0x1] }
 0x5bd   : > { %3948 = vmatpush3.bf16.msra.mxu1 %v4252_v61 }
 0x63e   : > { %v2797_v34 = vpop.f32.mrf.mxu0 }
 0x640   : > { %v2725_v35 = vpop.f32.mrf.mxu1  ;;  %v3873_v36 = vpop.f32.mrf.mxu0 }
 0x641   : > { %v2798_v49 = vadd.f32 %v2797_v34, %v2725_v35 }
 0x642   : > { %v3859_v37 = vpop.f32.mrf.mxu1  ;;  %v2800_v38 = vpop.f32.mrf.mxu0 }
 0x644   : > { %v2728_v39 = vpop.f32.mrf.mxu1  ;;  %v3874_v40 = vpop.f32.mrf.mxu0 }
 0x646   : > { %v3860_v41 = vpop.f32.mrf.mxu1 }
 0x652   : > { %v2969_v42 = vpop.f32.mrf.mxu0 }
 0x654   : > { %v2883_v43 = vpop.f32.mrf.mxu1  ;;  %v3901_v44 = vpop.f32.mrf.mxu0 }
 0x655   : > { %v2889_v50 = vadd.f32 %v2883_v43, %v2798_v49 }
 0x656   : > { %v3887_v45 = vpop.f32.mrf.mxu1  ;;  %v2972_v46 = vpop.f32.mrf.mxu0 }
 0x657   : > { %v2975_v51 = vadd.f32 %v2969_v42, %v2889_v50 }
 0x658   : > { %v2886_v47 = vpop.f32.mrf.mxu1  ;;  %v3902_v48 = vpop.f32.mrf.mxu0 }
 0x65a   : > { %v3888_v2 = vpop.f32.mrf.mxu1 }
 0x668   : > { %v3055_v52 = vpop.f32.mrf.mxu1 }
 0x669   : > { %v3061_v54 = vadd.f32 %v3055_v52, %v2975_v51 }
 0x66a   : > { %v3915_v55 = vpop.f32.mrf.mxu1 }
 0x66b   : > { %v3063_v56 = vadd.f32 %v3062_v53, %v3061_v54 }
 0x66c   : > { %v3058_v57 = vpop.f32.mrf.mxu1 }
 0x66d   : > { %v3064_v58 = vmax.f32 %v3063_v56, 0.0 }
 0x66e   : > { %v3916_v59 = vpop.f32.mrf.mxu1 }
 0x66f   : > { %v3080_v60 = vpack.c.bf16 %v3064_v58, %v3064_v58 }
 0x671   : > { %3934 = vmatmul.mubr.msk.bf16.vlgmr.msra.gmra.mxu0 %vm3127_vm15, %v3080_v60 }
 0x731   : > { %v3168_v1 = vpop.f32.mrf.mxu0 }
 0x732   : > { %v3169_v3 = vadd.f32 %v3168_v1, %v3081_v0 }
 0x733   : > { %v3935_v63 = vpop.f32.mrf.mxu0 }
 0x734   : > { %v3174_v4 = vmax.f32 %v3169_v3, 0.0 }
 0x735   : > { %v3171_v5 = vpop.f32.mrf.mxu0 }
 0x736   : > { %v3186_v6 = vpack.c.bf16 %v3174_v4, %v3174_v4 }
 0x737   : > { %v3936_v7 = vpop.f32.mrf.mxu0 }
 0x738   : > { %3950 = vmatmul.mubr.msk.bf16.vlgmr.msra.gmra.mxu1 %vm1730_vm10, %v3186_v6 }
 0x7f8   : > { %v3261_v8 = vpop.f32.mrf.mxu1 }
 0x7f9   : > { %v3262_v9 = vadd.f32 %v3261_v8, %v3187_v24 }
 0x7fa   : > { %v3951_v10 = vpop.f32.mrf.mxu1 }
 0x7fb   : > { %3268 = vst.msk [vmem:[%s486_s27] sm:$0x1] %vm3267_vm0, %v3262_v9 }
 0x7fc   : > { %v3264_v11 = vpop.f32.mrf.mxu1 }
 0x7fd   : > { %4266 = shalt.err (!%p4263_p3)
}
 0x7fe   : > { %s4267_s28 = scalar_lea.hbm %s5272_s23, 16  ;;  %s4271_s27 = scalar_lea.hbm %s5349_s17, 32 }
 0x7ff   : > { %p4268_p4 = scmp.ne.s32.totalorder %s5272_s23, %s4267_s28  ;;  %p4272_p9 = scmp.lt.s32.totalorder %s5272_s23, %s5349_s17 }
 0x800   : > { %p4273_p10 = scmp.lt.s32.totalorder %s4271_s27, %s4267_s28 }
 0x801   : > { %p4269_p7 = pnand %p4268_p4, %p4437_p5 }
 0x802   : > { %p4274_p11 = por %p4273_p10, %p4272_p9 }
 0x803   : > { %p4270_p8 = pneg %p4269_p7 }
 0x805   : > { %p4275_p12 = pnand %p4274_p11, %p4270_p8 }
 0x807   : > { %4278 = shalt.err (!%p4275_p12)
}
 0x808   : > { %3953 = dma.vmem_to_hbm [thread:$0]  (%p4437_p5), %s5274_s30, 16, %s5272_s23, %s3270_s24   ;;  %v3952_v12 = vpop.f32.mrf.mxu1 }
 0x809 PF: > { %s5350_s22 = sld [smem:[#allocation7_spill]] }
 0x80a   : > { %s5351_s29 = sld [smem:[#allocation5_spill]] }
 0x80f   : > { %p3959_p13 = scmp.ge.s32.totalorder %s5350_s22, 2 }
 0x810   : > { %s3294_s21 = sand.u32 1, %s5351_s29  }
 0x811   : > { %p3956_p0 = pnand %p3959_p13, %p4441_p6  ;;  %s3295_s15 = scalar_lea.sflag [#allocation3], %s3294_s21 }
 0x813   : > { %p3957_p1 = pneg %p3956_p0 }
 0x815   : > { %4296 = dma.done.wait (%p3957_p1), %s3295_s15, 16  }
 0x816   : > { %4298 = vsyncadd (%p3957_p1), %s3295_s15, 4294967280  ;;  %s5353_s21 = sld [smem:[#allocation8_spill]]  ;;  %s5356_s18 = smov %s4305_s19 }
 0x817   : > { %s5354_s28 = sld [smem:[#allocation6_spill]] }
 0x818   : > { %s5355_s20 = sld [smem:[#allocation9_spill]] }
 0x81c   : > { %p25_p2 = scmp.ge.s32.totalorder %s5353_s21, 4  }
 0x81d   : > { %s5357_s19 = smov %s5354_s28 }
 0x81e   :  { %27 = sbr.rel (!%p25_p2) target bundleno = 5 (0x5), region = 131 }
 0x823   :  { %3299 = vsyncpa [#allocation3], 1 }
 0x824   :  { %3301 = vsyncpa [#allocation3 + $0x1], 1 }

</bundles_post_ra>
